<compile_context>
chip_gen: v5e
topology: v5e:2x2
jax: 0.10.0
libtpu: 0.0.40
codegen_flags: <defaults>
</compile_context>

<pallas_src>
import functools

import jax
import jax.numpy as jnp
from jax.experimental import pallas as pl
from jax.experimental.pallas import tpu as pltpu


# ----------------------------------------------------------------------------
# Generation-aware VMEM budget and tile planning
# ----------------------------------------------------------------------------

@functools.lru_cache(maxsize=None)
def _hw_budget():
    """Scoped-VMEM budget keyed off the physical VMEM of the current chip."""
    try:
        phys = int(pltpu.get_tpu_info().vmem_capacity_bytes)
    except Exception:
        phys = 64 * 1024 * 1024          # conservative fallback (v7x-sized)
    if phys >= 96 * 1024 * 1024:         # v5e / v6e: 128 MiB physical VMEM
        return 64 * 1024 * 1024
    return 40 * 1024 * 1024              # v7x: 64 MiB physical VMEM


def _mosaic_params(semantics):
    return pltpu.CompilerParams(dimension_semantics=semantics,
                                vmem_limit_bytes=_hw_budget())


def _pick_tn(n, k, budget, target=1024):
    """Prefer the full output width (lane-dense stores, weight streamed once,
    LN computed once per row tile); otherwise the largest multiple of 128 that
    divides N; otherwise a 128-aligned fallback."""
    if n <= 128 or 2 * (k * n * 2) <= budget // 3:   # bf16 weight slab, 2x buffered
        return n
    t = min((target // 128) * 128, (n // 128) * 128)
    while t >= 128 and n % t:
        t -= 128
    return t if t >= 128 else n


def _pick_tm(m, k, tn, x_bytes, o_bytes, budget, target=512):
    """Largest row tile (<= target) whose double-buffered footprint fits."""
    tm = m if m <= target else target

    def footprint(t):
        return 2 * (t * k * x_bytes + k * tn * 2 + t * tn * o_bytes)

    while tm % 8 == 0 and tm > 64 and footprint(tm) > budget:
        tm //= 2
    return tm


# ----------------------------------------------------------------------------
# Exact (erf) GELU from Mosaic-safe ops (matches torch.nn.GELU to ~1.5e-7)
# ----------------------------------------------------------------------------

def _gelu_erf(x):
    z = x * 0.7071067811865476
    az = jnp.where(z >= 0.0, z, -z)
    t = 1.0 / (1.0 + 0.3275911 * az)
    poly = ((((1.061405429 * t - 1.453152027) * t + 1.421413741) * t
             - 0.284496736) * t + 0.254829592) * t
    erf_abs = 1.0 - poly * jnp.exp(-az * az)
    erf = jnp.where(z >= 0.0, erf_abs, -erf_abs)
    return 0.5 * x * (1.0 + erf)


# ----------------------------------------------------------------------------
# Pallas kernels (all matmuls are single-pass: K fully VMEM-resident)
# ----------------------------------------------------------------------------

def _mm_bias_kernel(x_ref, w_ref, b_ref, o_ref):
    y = jnp.dot(x_ref[...], w_ref[...], preferred_element_type=jnp.float32)
    o_ref[...] = (y + b_ref[...]).astype(o_ref.dtype)


def matmul_bias(x, w, b, out_dtype=jnp.float32):
    """x:[M,K](bf16) @ w:[K,N](bf16) + b:[N](f32); f32 accumulation; full-K."""
    M, K = x.shape
    N = w.shape[1]
    budget = int(_hw_budget() * 0.8)
    tn = _pick_tn(N, K, budget)
    tm = _pick_tm(M, K, tn, 2, jnp.dtype(out_dtype).itemsize, budget)
    return pl.pallas_call(
        _mm_bias_kernel,
        out_shape=jax.ShapeDtypeStruct((M, N), out_dtype),
        grid=(pl.cdiv(M, tm), pl.cdiv(N, tn)),
        in_specs=[
            pl.BlockSpec((tm, K), lambda i, j: (i, 0)),
            pl.BlockSpec((K, tn), lambda i, j: (0, j)),
            pl.BlockSpec((1, tn), lambda i, j: (0, j)),
        ],
        out_specs=pl.BlockSpec((tm, tn), lambda i, j: (i, j)),
        compiler_params=_mosaic_params(("parallel", "parallel")),
    )(x, w, b.reshape(1, N))


def _mm_ls_res_kernel(x_ref, w_ref, b_ref, ls_ref, res_ref, o_ref):
    y = jnp.dot(x_ref[...], w_ref[...], preferred_element_type=jnp.float32)
    y = y + b_ref[...]
    o_ref[...] = res_ref[...] + ls_ref[...] * y          # LayerScale + residual (f32)


def matmul_bias_ls_res(x, w, b, ls, res):
    """res + ls * (x @ w + b); projection, LayerScale and residual fused; the
    residual-stream buffer is reused in place (input_output_aliases)."""
    M, K = x.shape
    N = w.shape[1]
    budget = int(_hw_budget() * 0.8)
    tn = _pick_tn(N, K, budget)
    tm = _pick_tm(M, K, tn, 2, 4, budget)
    return pl.pallas_call(
        _mm_ls_res_kernel,
        out_shape=jax.ShapeDtypeStruct((M, N), jnp.float32),
        grid=(pl.cdiv(M, tm), pl.cdiv(N, tn)),
        in_specs=[
            pl.BlockSpec((tm, K), lambda i, j: (i, 0)),
            pl.BlockSpec((K, tn), lambda i, j: (0, j)),
            pl.BlockSpec((1, tn), lambda i, j: (0, j)),
            pl.BlockSpec((1, tn), lambda i, j: (0, j)),
            pl.BlockSpec((tm, tn), lambda i, j: (i, j)),
        ],
        out_specs=pl.BlockSpec((tm, tn), lambda i, j: (i, j)),
        input_output_aliases={4: 0},
        compiler_params=_mosaic_params(("parallel", "parallel")),
    )(x, w, b.reshape(1, N), ls.reshape(1, N), res)


def _ln_mm_kernel(x_ref, g_ref, bt_ref, w_ref, b_ref, o_ref, *, eps, activation):
    x = x_ref[...]                                           # (tm, D) f32
    mu = jnp.mean(x, axis=-1, keepdims=True)
    xc = x - mu
    var = jnp.mean(xc * xc, axis=-1, keepdims=True)          # biased var (torch LN)
    xn = xc * jax.lax.rsqrt(var + eps) * g_ref[...] + bt_ref[...]
    y = jnp.dot(xn.astype(jnp.bfloat16), w_ref[...],
                preferred_element_type=jnp.float32)
    y = y + b_ref[...]
    if activation == "gelu":
        y = _gelu_erf(y)
    o_ref[...] = y.astype(o_ref.dtype)


def ln_matmul_bias(x, gamma, beta, w, b, activation=None, eps=1e-6,
                   out_dtype=jnp.bfloat16):
    """LayerNorm(x) @ w + b (optional exact GELU).  LN statistics in f32 on the
    f32 residual stream; normalized tile cast to bf16 for the MXU.  The output
    width is kept full whenever the weight slab fits VMEM, so LN runs exactly
    once per row tile."""
    M, D = x.shape
    N = w.shape[1]
    budget = int(_hw_budget() * 0.8)
    tn = _pick_tn(N, D, budget)
    tm = _pick_tm(M, D, tn, 4, jnp.dtype(out_dtype).itemsize, budget)
    return pl.pallas_call(
        functools.partial(_ln_mm_kernel, eps=eps, activation=activation),
        out_shape=jax.ShapeDtypeStruct((M, N), out_dtype),
        grid=(pl.cdiv(M, tm), pl.cdiv(N, tn)),
        in_specs=[
            pl.BlockSpec((tm, D), lambda i, j: (i, 0)),
            pl.BlockSpec((1, D), lambda i, j: (0, 0)),
            pl.BlockSpec((1, D), lambda i, j: (0, 0)),
            pl.BlockSpec((D, tn), lambda i, j: (0, j)),
            pl.BlockSpec((1, tn), lambda i, j: (0, j)),
        ],
        out_specs=pl.BlockSpec((tm, tn), lambda i, j: (i, j)),
        compiler_params=_mosaic_params(("parallel", "parallel")),
    )(x, gamma.reshape(1, D), beta.reshape(1, D), w, b.reshape(1, N))


def _layernorm_kernel(x_ref, g_ref, b_ref, o_ref, *, eps):
    x = x_ref[...]
    mu = jnp.mean(x, axis=-1, keepdims=True)
    xc = x - mu
    var = jnp.mean(xc * xc, axis=-1, keepdims=True)
    o_ref[...] = xc * jax.lax.rsqrt(var + eps) * g_ref[...] + b_ref[...]


def layernorm(x, gamma, beta, eps=1e-6):
    """Row-tiled standalone LayerNorm (final cls-token norm only)."""
    M, D = x.shape
    tm = M if M <= 512 else 512
    return pl.pallas_call(
        functools.partial(_layernorm_kernel, eps=eps),
        out_shape=jax.ShapeDtypeStruct((M, D), jnp.float32),
        grid=(pl.cdiv(M, tm),),
        in_specs=[
            pl.BlockSpec((tm, D), lambda i: (i, 0)),
            pl.BlockSpec((1, D), lambda i: (0, 0)),
            pl.BlockSpec((1, D), lambda i: (0, 0)),
        ],
        out_specs=pl.BlockSpec((tm, D), lambda i: (i, 0)),
        compiler_params=_mosaic_params(("parallel",)),
    )(x, gamma.reshape(1, D), beta.reshape(1, D))


def _flash_attn_kernel(q_ref, k_ref, v_ref, o_ref, m_ref, l_ref, acc_ref, *,
                       scale, n_tokens, tkv):
    kv = pl.program_id(2)

    @pl.when(kv == 0)
    def _():
        m_ref[...] = jnp.full(m_ref.shape, -jnp.inf, m_ref.dtype)
        l_ref[...] = jnp.zeros(l_ref.shape, l_ref.dtype)
        acc_ref[...] = jnp.zeros(acc_ref.shape, acc_ref.dtype)

    # Fold the softmax scale into q: O(Nt*dh) instead of O(Nt^2).
    q = (q_ref[0, 0].astype(jnp.float32) * scale).astype(jnp.bfloat16)   # (Nt, dh)
    k = k_ref[0, 0]                                                      # (tkv, dh)
    # q @ k^T without materializing a transpose: contract the head_dim axis.
    s = jax.lax.dot_general(q, k, (((1,), (1,)), ((), ())),
                            preferred_element_type=jnp.float32)          # (Nt, tkv)
    if n_tokens % tkv != 0:   # mask the padded kv columns of the ragged last block
        col = kv * tkv + jax.lax.broadcasted_iota(jnp.int32, s.shape, 1)
        s = jnp.where(col < n_tokens, s, -jnp.inf)

    m_prev = m_ref[...]
    m_new = jnp.maximum(m_prev, jnp.max(s, axis=-1, keepdims=True))
    alpha = jnp.exp(m_prev - m_new)
    p = jnp.exp(s - m_new)
    l_ref[...] = alpha * l_ref[...] + jnp.sum(p, axis=-1, keepdims=True)
    acc_ref[...] = alpha * acc_ref[...] + jnp.dot(
        p.astype(jnp.bfloat16), v_ref[0, 0], preferred_element_type=jnp.float32)
    m_ref[...] = m_new

    @pl.when(kv == pl.num_programs(2) - 1)
    def _():
        # approx reciprocal (EUP) on the (Nt,1) softmax denominator only.
        o_ref[0, 0] = (acc_ref[...] *
                       pl.reciprocal(l_ref[...], approx=True)).astype(o_ref.dtype)


def flash_attention(qkv_h, *, num_heads, scale):
    """qkv_h: [B, 3*H, Nt, dh] bf16 where axis 1 is [q_h0..q_hH-1, k_*, v_*].
    Flash-style online-softmax attention, grid = (batch, head, kv-tile).
    Returns [B, H, Nt, dh] bf16."""
    B, threeH, Nt, dh = qkv_h.shape
    H = num_heads
    tkv = Nt if Nt <= 1024 else 512
    nkv = pl.cdiv(Nt, tkv)
    kernel = functools.partial(_flash_attn_kernel, scale=scale,
                               n_tokens=Nt, tkv=tkv)
    return pl.pallas_call(
        kernel,
        out_shape=jax.ShapeDtypeStruct((B, H, Nt, dh), jnp.bfloat16),
        grid=(B, H, nkv),
        in_specs=[
            pl.BlockSpec((1, 1, Nt, dh), lambda b, h, j: (b, h, 0, 0)),
            pl.BlockSpec((1, 1, tkv, dh), lambda b, h, j: (b, H + h, j, 0)),
            pl.BlockSpec((1, 1, tkv, dh), lambda b, h, j: (b, 2 * H + h, j, 0)),
        ],
        out_specs=pl.BlockSpec((1, 1, Nt, dh), lambda b, h, j: (b, h, 0, 0)),
        scratch_shapes=[pltpu.VMEM((Nt, 1), jnp.float32),
                        pltpu.VMEM((Nt, 1), jnp.float32),
                        pltpu.VMEM((Nt, dh), jnp.float32)],
        compiler_params=_mosaic_params(("parallel", "parallel", "arbitrary")),
    )(qkv_h, qkv_h, qkv_h)


# ----------------------------------------------------------------------------
# Parameter construction (deterministic, synthetic) and full forward pass
# ----------------------------------------------------------------------------

def init_params(key, *, in_chans, patch_size, embed_dim, depth, num_heads,
                mlp_ratio, num_tokens):
    keys = jax.random.split(key, 4 + depth)
    std = 0.02
    hidden = int(embed_dim * mlp_ratio)
    wdt = jnp.bfloat16    # MXU operand dtype; accumulation / LN / residual stay f32
    params = {
        "patch_w": (std * jax.random.normal(
            keys[0], (in_chans * patch_size * patch_size, embed_dim),
            jnp.float32)).astype(wdt),
        "patch_b": jnp.zeros((embed_dim,), jnp.float32),
        "cls_token": std * jax.random.normal(keys[1], (1, 1, embed_dim), jnp.float32),
        # pos_embed built directly at the token count implied by (H,W,stride)
        # (stands in for timm's dynamic_img_size interpolation).
        "pos_embed": std * jax.random.normal(
            keys[2], (1, num_tokens, embed_dim), jnp.float32),
        "norm_g": jnp.ones((embed_dim,), jnp.float32),
        "norm_b": jnp.zeros((embed_dim,), jnp.float32),
        "blocks": [],
    }
    for d in range(depth):
        bk = jax.random.split(keys[4 + d], 4)
        params["blocks"].append({
            "ln1_g": jnp.ones((embed_dim,), jnp.float32),
            "ln1_b": jnp.zeros((embed_dim,), jnp.float32),
            "qkv_w": (std * jax.random.normal(
                bk[0], (embed_dim, 3 * embed_dim), jnp.float32)).astype(wdt),
            "qkv_b": jnp.zeros((3 * embed_dim,), jnp.float32),
            "proj_w": (std * jax.random.normal(
                bk[1], (embed_dim, embed_dim), jnp.float32)).astype(wdt),
            "proj_b": jnp.zeros((embed_dim,), jnp.float32),
            "ls1": 1e-5 * jnp.ones((embed_dim,), jnp.float32),  # DINOv2 LayerScale
            "ln2_g": jnp.ones((embed_dim,), jnp.float32),
            "ln2_b": jnp.zeros((embed_dim,), jnp.float32),
            "fc1_w": (std * jax.random.normal(
                bk[2], (embed_dim, hidden), jnp.float32)).astype(wdt),
            "fc1_b": jnp.zeros((hidden,), jnp.float32),
            "fc2_w": (std * jax.random.normal(
                bk[3], (hidden, embed_dim), jnp.float32)).astype(wdt),
            "fc2_b": jnp.zeros((embed_dim,), jnp.float32),
            "ls2": 1e-5 * jnp.ones((embed_dim,), jnp.float32),
        })
    return params


def vit_wrapper_forward(x, params, *, patch_size, stride, embed_dim, num_heads):
    """Equivalent of ViTWrapper.forward(x): timm ViT with overridden conv stride,
    num_classes=0 (Identity head), 'token' pooling -> returns [B, embed_dim]."""
    B, C, H, W = x.shape
    p, s = patch_size, stride
    Hg = (H - p) // s + 1
    Wg = (W - p) // s + 1
    Np = Hg * Wg
    D = embed_dim
    dh = D // num_heads
    K = C * p * p

    # Patch extraction as one feature-last XLA window-gather (no transpose copy).
    # Feature order is (C, ph, pw), matching a flattened torch conv weight [D,C,p,p].
    patches = jax.lax.conv_general_dilated_patches(
        x, filter_shape=(p, p), window_strides=(s, s), padding="VALID",
        dimension_numbers=("NCHW", "OIHW", "NHWC"))            # [B, Hg, Wg, K]
    patches = patches.reshape(B * Np, K)

    # Patch embedding (the strided conv == matmul over flattened patches).
    tok = matmul_bias(patches.astype(jnp.bfloat16), params["patch_w"],
                      params["patch_b"])                       # [B*Np, D] f32
    tok = tok.reshape(B, Np, D)

    cls = jnp.broadcast_to(params["cls_token"], (B, 1, D))
    z = jnp.concatenate([cls, tok], axis=1) + params["pos_embed"]   # [B, Nt, D] f32
    Nt = 1 + Np
    M = B * Nt
    zf = z.reshape(M, D)

    scale = dh ** -0.5
    for blk in params["blocks"]:
        # --- attention branch: LN fused into the QKV projection ---
        qkv = ln_matmul_bias(zf, blk["ln1_g"], blk["ln1_b"],
                             blk["qkv_w"], blk["qkv_b"])             # [M, 3D] bf16
        # [M,3D] -> [B, 3*H, Nt, dh] so the attention grid can split (batch, head).
        qkv_h = jnp.transpose(qkv.reshape(B, Nt, 3, num_heads, dh),
                              (0, 2, 3, 1, 4)).reshape(B, 3 * num_heads, Nt, dh)
        a = flash_attention(qkv_h, num_heads=num_heads, scale=scale)  # [B,H,Nt,dh]
        a = jnp.transpose(a, (0, 2, 1, 3)).reshape(M, D)              # [M, D] bf16
        zf = matmul_bias_ls_res(a, blk["proj_w"], blk["proj_b"],
                                blk["ls1"], zf)                       # [M, D] f32

        # --- MLP branch: LN fused into fc1 (+ exact-erf GELU epilogue) ---
        h = ln_matmul_bias(zf, blk["ln2_g"], blk["ln2_b"],
                           blk["fc1_w"], blk["fc1_b"], activation="gelu")
        zf = matmul_bias_ls_res(h, blk["fc2_w"], blk["fc2_b"], blk["ls2"], zf)

    # Final LN + 'token' pooling + Identity head (num_classes=0).
    # LN is per-row, so norm-then-pool == pool-then-norm: only normalize cls rows.
    cls_tok = zf.reshape(B, Nt, D)[:, 0]                            # [B, D] f32
    return layernorm(cls_tok, params["norm_g"], params["norm_b"])   # [B, D] f32


# ----------------------------------------------------------------------------
# Main
# ----------------------------------------------------------------------------

if __name__ == "__main__":
    # Small config consistent with the wrapper: patch_size=8, stride=4
    # (stride evenly divides patch size, as asserted in ViTWrapper.__init__).
    B, C, H, W = 2, 3, 16, 16
    patch_size, stride = 8, 4
    embed_dim, depth, num_heads, mlp_ratio = 32, 2, 4, 4.0

    Hg = (H - patch_size) // stride + 1
    Wg = (W - patch_size) // stride + 1
    num_tokens = 1 + Hg * Wg

    key = jax.random.PRNGKey(0)
    kx, kp = jax.random.split(key)
    x = jax.random.normal(kx, (B, C, H, W), jnp.float32)
    params = init_params(kp, in_chans=C, patch_size=patch_size, embed_dim=embed_dim,
                         depth=depth, num_heads=num_heads, mlp_ratio=mlp_ratio,
                         num_tokens=num_tokens)

    fwd = jax.jit(functools.partial(vit_wrapper_forward,
                                    patch_size=patch_size, stride=stride,
                                    embed_dim=embed_dim, num_heads=num_heads))
    out = fwd(x, params)
    jax.block_until_ready(out)
    assert out.shape == (B, embed_dim) and out.dtype == jnp.float32
    print("KERNEL_OK")
</pallas_src>

<mosaic_0001>
module attributes {stable_mosaic.version = 11 : i64} {
  func.func @_mm_bias_kernel(%arg0: i32, %arg1: i32, %arg2: memref<18x192xbf16, #tpu.memory_space<vmem>>, %arg3: memref<192x32xbf16, #tpu.memory_space<vmem>>, %arg4: memref<1x32xf32, #tpu.memory_space<vmem>>, %arg5: memref<18x32xf32, #tpu.memory_space<vmem>>) attributes {dimension_semantics = [#tpu.dimension_semantics<parallel>, #tpu.dimension_semantics<parallel>], iteration_bounds = array<i64: 1, 1>, scalar_prefetch = 0 : i64, scratch_operands = 0 : i64, tpu.core_type = #tpu.core_type<tc>, window_params = [{transform_indices = @transform_0, window_bounds = array<i64: 18, 192>}, {transform_indices = @transform_1, window_bounds = array<i64: 192, 32>}, {transform_indices = @transform_2, window_bounds = array<i64: 1, 32>}, {transform_indices = @transform_3, window_bounds = array<i64: 18, 32>}]} {
    %c0 = arith.constant 0 : index
    %c0_0 = arith.constant 0 : index
    %0 = vector.load %arg2[%c0, %c0_0] : memref<18x192xbf16, #tpu.memory_space<vmem>>, vector<18x192xbf16>
    %c0_1 = arith.constant 0 : index
    %c0_2 = arith.constant 0 : index
    %1 = vector.load %arg3[%c0_1, %c0_2] : memref<192x32xbf16, #tpu.memory_space<vmem>>, vector<192x32xbf16>
    %cst = arith.constant dense<0.000000e+00> : vector<18x32xf32>
    %2 = tpu.matmul %0, %1, %cst {dimension_numbers = #tpu.dot_dimension_numbers<[1], [0], [0], [1], [0, 0, 1, 1], [], []>} : vector<18x192xbf16>, vector<192x32xbf16>, vector<18x32xf32> -> vector<18x32xf32>
    %c0_3 = arith.constant 0 : index
    %c0_4 = arith.constant 0 : index
    %3 = vector.load %arg4[%c0_3, %c0_4] : memref<1x32xf32, #tpu.memory_space<vmem>>, vector<1x32xf32>
    %4 = vector.broadcast %3 : vector<1x32xf32> to vector<18x32xf32>
    %5 = arith.addf %2, %4 : vector<18x32xf32>
    %c0_5 = arith.constant 0 : index
    %c0_6 = arith.constant 0 : index
    %6 = vector.load %arg5[%c0_5, %c0_6] : memref<18x32xf32, #tpu.memory_space<vmem>>, vector<18x32xf32>
    tpu.vector_store %arg5[%c0_5, %c0_6], %5 {strides = array<i32>} : memref<18x32xf32, #tpu.memory_space<vmem>>, vector<18x32xf32>,
    return
  }
  func.func @transform_0(%arg0: i32, %arg1: i32) -> (i32, i32) {
    %c0_i32 = arith.constant 0 : i32
    %c0_i32_0 = arith.constant 0 : i32
    return %arg0, %c0_i32 : i32, i32
  }
  func.func @transform_1(%arg0: i32, %arg1: i32) -> (i32, i32) {
    %c0_i32 = arith.constant 0 : i32
    %c0_i32_0 = arith.constant 0 : i32
    return %c0_i32, %arg1 : i32, i32
  }
  func.func @transform_2(%arg0: i32, %arg1: i32) -> (i32, i32) {
    %c0_i32 = arith.constant 0 : i32
    %c0_i32_0 = arith.constant 0 : i32
    return %c0_i32, %arg1 : i32, i32
  }
  func.func @transform_3(%arg0: i32, %arg1: i32) -> (i32, i32) {
    %c0_i32 = arith.constant 0 : i32
    return %arg0, %arg1 : i32, i32
  }
}

module attributes {stable_mosaic.version = 11 : i64} {
  func.func @_ln_mm_kernel(%arg0: i32, %arg1: i32, %arg2: memref<20x32xf32, #tpu.memory_space<vmem>>, %arg3: memref<1x32xf32, #tpu.memory_space<vmem>>, %arg4: memref<1x32xf32, #tpu.memory_space<vmem>>, %arg5: memref<32x96xbf16, #tpu.memory_space<vmem>>, %arg6: memref<1x96xf32, #tpu.memory_space<vmem>>, %arg7: memref<20x96xbf16, #tpu.memory_space<vmem>>) attributes {dimension_semantics = [#tpu.dimension_semantics<parallel>, #tpu.dimension_semantics<parallel>], iteration_bounds = array<i64: 1, 1>, scalar_prefetch = 0 : i64, scratch_operands = 0 : i64, tpu.core_type = #tpu.core_type<tc>, window_params = [{transform_indices = @transform_0, window_bounds = array<i64: 20, 32>}, {pipeline_mode = #tpu.pipeline_mode<synchronous>, transform_indices = @transform_1, window_bounds = array<i64: 1, 32>}, {pipeline_mode = #tpu.pipeline_mode<synchronous>, transform_indices = @transform_2, window_bounds = array<i64: 1, 32>}, {transform_indices = @transform_3, window_bounds = array<i64: 32, 96>}, {transform_indices = @transform_4, window_bounds = array<i64: 1, 96>}, {transform_indices = @transform_5, window_bounds = array<i64: 20, 96>}]} {
    %c0 = arith.constant 0 : index
    %c0_0 = arith.constant 0 : index
    %0 = vector.load %arg2[%c0, %c0_0] : memref<20x32xf32, #tpu.memory_space<vmem>>, vector<20x32xf32>
    %cst = arith.constant dense<0.000000e+00> : vector<20xf32>
    %1 = vector.multi_reduction <add>, %0, %cst [1] : vector<20x32xf32> to vector<20xf32>
    %2 = vector.shape_cast %1 : vector<20xf32> to vector<20x1xf32>
    %cst_1 = arith.constant 3.200000e+01 : f32
    %3 = vector.broadcast %cst_1 : f32 to vector<20x1xf32>
    %4 = arith.divf %2, %3 : vector<20x1xf32>
    %5 = vector.broadcast %4 : vector<20x1xf32> to vector<20x32xf32>
    %6 = arith.subf %0, %5 : vector<20x32xf32>
    %7 = arith.mulf %6, %6 : vector<20x32xf32>
    %cst_2 = arith.constant dense<0.000000e+00> : vector<20xf32>
    %8 = vector.multi_reduction <add>, %7, %cst_2 [1] : vector<20x32xf32> to vector<20xf32>
    %9 = vector.shape_cast %8 : vector<20xf32> to vector<20x1xf32>
    %cst_3 = arith.constant 3.200000e+01 : f32
    %10 = vector.broadcast %cst_3 : f32 to vector<20x1xf32>
    %11 = arith.divf %9, %10 : vector<20x1xf32>
    %cst_4 = arith.constant 9.99999997E-7 : f32
    %12 = vector.broadcast %cst_4 : f32 to vector<20x1xf32>
    %13 = arith.addf %11, %12 : vector<20x1xf32>
    %14 = math.rsqrt %13 : vector<20x1xf32>
    %15 = vector.broadcast %14 : vector<20x1xf32> to vector<20x32xf32>
    %16 = arith.mulf %6, %15 : vector<20x32xf32>
    %c0_5 = arith.constant 0 : index
    %c0_6 = arith.constant 0 : index
    %17 = vector.load %arg3[%c0_5, %c0_6] : memref<1x32xf32, #tpu.memory_space<vmem>>, vector<1x32xf32>
    %18 = vector.broadcast %17 : vector<1x32xf32> to vector<20x32xf32>
    %19 = arith.mulf %16, %18 : vector<20x32xf32>
    %c0_7 = arith.constant 0 : index
    %c0_8 = arith.constant 0 : index
    %20 = vector.load %arg4[%c0_7, %c0_8] : memref<1x32xf32, #tpu.memory_space<vmem>>, vector<1x32xf32>
    %21 = vector.broadcast %20 : vector<1x32xf32> to vector<20x32xf32>
    %22 = arith.addf %19, %21 : vector<20x32xf32>
    %23 = arith.truncf %22 : vector<20x32xf32> to vector<20x32xbf16>
    %c0_9 = arith.constant 0 : index
    %c0_10 = arith.constant 0 : index
    %24 = vector.load %arg5[%c0_9, %c0_10] : memref<32x96xbf16, #tpu.memory_space<vmem>>, vector<32x96xbf16>
    %cst_11 = arith.constant dense<0.000000e+00> : vector<20x96xf32>
    %25 = tpu.matmul %23, %24, %cst_11 {dimension_numbers = #tpu.dot_dimension_numbers<[1], [0], [0], [1], [0, 0, 1, 1], [], []>} : vector<20x32xbf16>, vector<32x96xbf16>, vector<20x96xf32> -> vector<20x96xf32>
    %c0_12 = arith.constant 0 : index
    %c0_13 = arith.constant 0 : index
    %26 = vector.load %arg6[%c0_12, %c0_13] : memref<1x96xf32, #tpu.memory_space<vmem>>, vector<1x96xf32>
    %27 = vector.broadcast %26 : vector<1x96xf32> to vector<20x96xf32>
    %28 = arith.addf %25, %27 : vector<20x96xf32>
    %29 = arith.truncf %28 : vector<20x96xf32> to vector<20x96xbf16>
    %c0_14 = arith.constant 0 : index
    %c0_15 = arith.constant 0 : index
    %30 = vector.load %arg7[%c0_14, %c0_15] : memref<20x96xbf16, #tpu.memory_space<vmem>>, vector<20x96xbf16>
    tpu.vector_store %arg7[%c0_14, %c0_15], %29 {strides = array<i32>} : memref<20x96xbf16, #tpu.memory_space<vmem>>, vector<20x96xbf16>,
    return
  }
  func.func @transform_0(%arg0: i32, %arg1: i32) -> (i32, i32) {
    %c0_i32 = arith.constant 0 : i32
    %c0_i32_0 = arith.constant 0 : i32
    return %arg0, %c0_i32 : i32, i32
  }
  func.func @transform_1(%arg0: i32, %arg1: i32) -> (i32, i32) {
    %c0_i32 = arith.constant 0 : i32
    %c0_i32_0 = arith.constant 0 : i32
    %c0_i32_1 = arith.constant 0 : i32
    return %c0_i32, %c0_i32_0 : i32, i32
  }
  func.func @transform_2(%arg0: i32, %arg1: i32) -> (i32, i32) {
    %c0_i32 = arith.constant 0 : i32
    %c0_i32_0 = arith.constant 0 : i32
    %c0_i32_1 = arith.constant 0 : i32
    return %c0_i32, %c0_i32_0 : i32, i32
  }
  func.func @transform_3(%arg0: i32, %arg1: i32) -> (i32, i32) {
    %c0_i32 = arith.constant 0 : i32
    %c0_i32_0 = arith.constant 0 : i32
    return %c0_i32, %arg1 : i32, i32
  }
  func.func @transform_4(%arg0: i32, %arg1: i32) -> (i32, i32) {
    %c0_i32 = arith.constant 0 : i32
    %c0_i32_0 = arith.constant 0 : i32
    return %c0_i32, %arg1 : i32, i32
  }
  func.func @transform_5(%arg0: i32, %arg1: i32) -> (i32, i32) {
    %c0_i32 = arith.constant 0 : i32
    return %arg0, %arg1 : i32, i32
  }
}

module attributes {stable_mosaic.version = 11 : i64} {
  func.func @_flash_attn_kernel(%arg0: i32, %arg1: i32, %arg2: i32, %arg3: memref<1x1x10x8xbf16, #tpu.memory_space<vmem>>, %arg4: memref<1x1x10x8xbf16, #tpu.memory_space<vmem>>, %arg5: memref<1x1x10x8xbf16, #tpu.memory_space<vmem>>, %arg6: memref<1x1x10x8xbf16, #tpu.memory_space<vmem>>, %arg7: memref<10x1xf32, #tpu.memory_space<vmem>>, %arg8: memref<10x1xf32, #tpu.memory_space<vmem>>, %arg9: memref<10x8xf32, #tpu.memory_space<vmem>>) attributes {dimension_semantics = [#tpu.dimension_semantics<parallel>, #tpu.dimension_semantics<parallel>, #tpu.dimension_semantics<arbitrary>], iteration_bounds = array<i64: 2, 4, 1>, scalar_prefetch = 0 : i64, scratch_operands = 3 : i64, tpu.core_type = #tpu.core_type<tc>, window_params = [{transform_indices = @transform_0, window_bounds = array<i64: 1, 1, 10, 8>}, {transform_indices = @transform_1, window_bounds = array<i64: 1, 1, 10, 8>}, {transform_indices = @transform_2, window_bounds = array<i64: 1, 1, 10, 8>}, {transform_indices = @transform_3, window_bounds = array<i64: 1, 1, 10, 8>}]} {
    %c0_i32 = arith.constant 0 : i32
    %0 = arith.cmpi eq, %arg2, %c0_i32 : i32
    %1 = arith.extui %0 : i1 to i32
    %c0_i32_0 = arith.constant 0 : i32
    %2 = arith.cmpi ne, %1, %c0_i32_0 : i32
    scf.if %2 {
      %cst_30 = arith.constant 0xFF800000 : f32
      %40 = vector.broadcast %cst_30 : f32 to vector<10x1xf32>
      %c0_31 = arith.constant 0 : index
      %c0_32 = arith.constant 0 : index
      %41 = vector.load %arg7[%c0_31, %c0_32] : memref<10x1xf32, #tpu.memory_space<vmem>>, vector<10x1xf32>
      tpu.vector_store %arg7[%c0_31, %c0_32], %40 {strides = array<i32>} : memref<10x1xf32, #tpu.memory_space<vmem>>, vector<10x1xf32>,
      %cst_33 = arith.constant 0.000000e+00 : f32
      %42 = vector.broadcast %cst_33 : f32 to vector<10x1xf32>
      %c0_34 = arith.constant 0 : index
      %c0_35 = arith.constant 0 : index
      %43 = vector.load %arg8[%c0_34, %c0_35] : memref<10x1xf32, #tpu.memory_space<vmem>>, vector<10x1xf32>
      tpu.vector_store %arg8[%c0_34, %c0_35], %42 {strides = array<i32>} : memref<10x1xf32, #tpu.memory_space<vmem>>, vector<10x1xf32>,
      %cst_36 = arith.constant 0.000000e+00 : f32
      %44 = vector.broadcast %cst_36 : f32 to vector<10x8xf32>
      %c0_37 = arith.constant 0 : index
      %c0_38 = arith.constant 0 : index
      %45 = vector.load %arg9[%c0_37, %c0_38] : memref<10x8xf32, #tpu.memory_space<vmem>>, vector<10x8xf32>
      tpu.vector_store %arg9[%c0_37, %c0_38], %44 {strides = array<i32>} : memref<10x8xf32, #tpu.memory_space<vmem>>, vector<10x8xf32>,
    } else {
    }
    %c0 = arith.constant 0 : index
    %c0_1 = arith.constant 0 : index
    %c0_2 = arith.constant 0 : index
    %c0_3 = arith.constant 0 : index
    %3 = vector.load %arg3[%c0, %c0_1, %c0_2, %c0_3] : memref<1x1x10x8xbf16, #tpu.memory_space<vmem>>, vector<1x1x10x8xbf16>
    %4 = vector.shape_cast %3 : vector<1x1x10x8xbf16> to vector<10x8xbf16>
    %5 = arith.extf %4 : vector<10x8xbf16> to vector<10x8xf32>
    %cst = arith.constant 0.353553385 : f32
    %6 = vector.broadcast %cst : f32 to vector<10x8xf32>
    %7 = arith.mulf %5, %6 : vector<10x8xf32>
    %8 = arith.truncf %7 : vector<10x8xf32> to vector<10x8xbf16>
    %c0_4 = arith.constant 0 : index
    %c0_5 = arith.constant 0 : index
    %c0_6 = arith.constant 0 : index
    %c0_7 = arith.constant 0 : index
    %9 = vector.load %arg4[%c0_4, %c0_5, %c0_6, %c0_7] : memref<1x1x10x8xbf16, #tpu.memory_space<vmem>>, vector<1x1x10x8xbf16>
    %10 = vector.shape_cast %9 : vector<1x1x10x8xbf16> to vector<10x8xbf16>
    %cst_8 = arith.constant dense<0.000000e+00> : vector<10x10xf32>
    %11 = tpu.matmul %8, %10, %cst_8 {dimension_numbers = #tpu.dot_dimension_numbers<[1], [1], [0], [0], [0, 0, 1, 0], [], []>} : vector<10x8xbf16>, vector<10x8xbf16>, vector<10x10xf32> -> vector<10x10xf32>
    %c0_9 = arith.constant 0 : index
    %c0_10 = arith.constant 0 : index
    %12 = vector.load %arg7[%c0_9, %c0_10] : memref<10x1xf32, #tpu.memory_space<vmem>>, vector<10x1xf32>
    %cst_11 = arith.constant dense<0xFF800000> : vector<10xf32>
    %13 = vector.multi_reduction <maximumf>, %11, %cst_11 [1] : vector<10x10xf32> to vector<10xf32>
    %14 = vector.shape_cast %13 : vector<10xf32> to vector<10x1xf32>
    %15 = arith.maximumf %12, %14 : vector<10x1xf32>
    %16 = arith.subf %12, %15 : vector<10x1xf32>
    %17 = math.exp %16 : vector<10x1xf32>
    %18 = vector.broadcast %15 : vector<10x1xf32> to vector<10x10xf32>
    %19 = arith.subf %11, %18 : vector<10x10xf32>
    %20 = math.exp %19 : vector<10x10xf32>
    %c0_12 = arith.constant 0 : index
    %c0_13 = arith.constant 0 : index
    %21 = vector.load %arg8[%c0_12, %c0_13] : memref<10x1xf32, #tpu.memory_space<vmem>>, vector<10x1xf32>
    %22 = arith.mulf %17, %21 : vector<10x1xf32>
    %cst_14 = arith.constant dense<0.000000e+00> : vector<10xf32>
    %23 = vector.multi_reduction <add>, %20, %cst_14 [1] : vector<10x10xf32> to vector<10xf32>
    %24 = vector.shape_cast %23 : vector<10xf32> to vector<10x1xf32>
    %25 = arith.addf %22, %24 : vector<10x1xf32>
    %c0_15 = arith.constant 0 : index
    %c0_16 = arith.constant 0 : index
    %26 = vector.load %arg8[%c0_15, %c0_16] : memref<10x1xf32, #tpu.memory_space<vmem>>, vector<10x1xf32>
    tpu.vector_store %arg8[%c0_15, %c0_16], %25 {strides = array<i32>} : memref<10x1xf32, #tpu.memory_space<vmem>>, vector<10x1xf32>,
    %c0_17 = arith.constant 0 : index
    %c0_18 = arith.constant 0 : index
    %27 = vector.load %arg9[%c0_17, %c0_18] : memref<10x8xf32, #tpu.memory_space<vmem>>, vector<10x8xf32>
    %28 = vector.broadcast %17 : vector<10x1xf32> to vector<10x8xf32>
    %29 = arith.mulf %28, %27 : vector<10x8xf32>
    %30 = arith.truncf %20 : vector<10x10xf32> to vector<10x10xbf16>
    %c0_19 = arith.constant 0 : index
    %c0_20 = arith.constant 0 : index
    %c0_21 = arith.constant 0 : index
    %c0_22 = arith.constant 0 : index
    %31 = vector.load %arg5[%c0_19, %c0_20, %c0_21, %c0_22] : memref<1x1x10x8xbf16, #tpu.memory_space<vmem>>, vector<1x1x10x8xbf16>
    %32 = vector.shape_cast %31 : vector<1x1x10x8xbf16> to vector<10x8xbf16>
    %cst_23 = arith.constant dense<0.000000e+00> : vector<10x8xf32>
    %33 = tpu.matmul %30, %32, %cst_23 {dimension_numbers = #tpu.dot_dimension_numbers<[1], [0], [0], [1], [0, 0, 1, 1], [], []>} : vector<10x10xbf16>, vector<10x8xbf16>, vector<10x8xf32> -> vector<10x8xf32>
    %34 = arith.addf %29, %33 : vector<10x8xf32>
    %c0_24 = arith.constant 0 : index
    %c0_25 = arith.constant 0 : index
    %35 = vector.load %arg9[%c0_24, %c0_25] : memref<10x8xf32, #tpu.memory_space<vmem>>, vector<10x8xf32>
    tpu.vector_store %arg9[%c0_24, %c0_25], %34 {strides = array<i32>} : memref<10x8xf32, #tpu.memory_space<vmem>>, vector<10x8xf32>,
    %c0_26 = arith.constant 0 : index
    %c0_27 = arith.constant 0 : index
    %36 = vector.load %arg7[%c0_26, %c0_27] : memref<10x1xf32, #tpu.memory_space<vmem>>, vector<10x1xf32>
    tpu.vector_store %arg7[%c0_26, %c0_27], %15 {strides = array<i32>} : memref<10x1xf32, #tpu.memory_space<vmem>>, vector<10x1xf32>,
    %c0_i32_28 = arith.constant 0 : i32
    %37 = arith.cmpi eq, %arg2, %c0_i32_28 : i32
    %38 = arith.extui %37 : i1 to i32
    %c0_i32_29 = arith.constant 0 : i32
    %39 = arith.cmpi ne, %38, %c0_i32_29 : i32
    scf.if %39 {
      %c0_30 = arith.constant 0 : index
      %c0_31 = arith.constant 0 : index
      %40 = vector.load %arg9[%c0_30, %c0_31] : memref<10x8xf32, #tpu.memory_space<vmem>>, vector<10x8xf32>
      %c0_32 = arith.constant 0 : index
      %c0_33 = arith.constant 0 : index
      %41 = vector.load %arg8[%c0_32, %c0_33] : memref<10x1xf32, #tpu.memory_space<vmem>>, vector<10x1xf32>
      %42 = tpu.reciprocal %41 {approx = true} : vector<10x1xf32> -> vector<10x1xf32>
      %43 = vector.broadcast %42 : vector<10x1xf32> to vector<10x8xf32>
      %44 = arith.mulf %40, %43 : vector<10x8xf32>
      %45 = arith.truncf %44 : vector<10x8xf32> to vector<10x8xbf16>
      %c0_34 = arith.constant 0 : index
      %c0_35 = arith.constant 0 : index
      %c0_36 = arith.constant 0 : index
      %c0_37 = arith.constant 0 : index
      %46 = vector.load %arg6[%c0_34, %c0_35, %c0_36, %c0_37] : memref<1x1x10x8xbf16, #tpu.memory_space<vmem>>, vector<1x1x10x8xbf16>
      %47 = vector.shape_cast %46 : vector<1x1x10x8xbf16> to vector<10x8xbf16>
      %48 = vector.shape_cast %45 : vector<10x8xbf16> to vector<1x1x10x8xbf16>
      tpu.vector_store %arg6[%c0_34, %c0_35, %c0_36, %c0_37], %48 {strides = array<i32>} : memref<1x1x10x8xbf16, #tpu.memory_space<vmem>>, vector<1x1x10x8xbf16>,
    } else {
    }
    return
  }
  func.func @transform_0(%arg0: i32, %arg1: i32, %arg2: i32) -> (i32, i32, i32, i32) {
    %c0_i32 = arith.constant 0 : i32
    %c0_i32_0 = arith.constant 0 : i32
    %c0_i32_1 = arith.constant 0 : i32
    return %arg0, %arg1, %c0_i32, %c0_i32_0 : i32, i32, i32, i32
  }
  func.func @transform_1(%arg0: i32, %arg1: i32, %arg2: i32) -> (i32, i32, i32, i32) {
    %c4_i32 = arith.constant 4 : i32
    %0 = arith.addi %c4_i32, %arg1 : i32
    %c0_i32 = arith.constant 0 : i32
    %c0_i32_0 = arith.constant 0 : i32
    return %arg0, %0, %arg2, %c0_i32 : i32, i32, i32, i32
  }
  func.func @transform_2(%arg0: i32, %arg1: i32, %arg2: i32) -> (i32, i32, i32, i32) {
    %c8_i32 = arith.constant 8 : i32
    %0 = arith.addi %c8_i32, %arg1 : i32
    %c0_i32 = arith.constant 0 : i32
    %c0_i32_0 = arith.constant 0 : i32
    return %arg0, %0, %arg2, %c0_i32 : i32, i32, i32, i32
  }
  func.func @transform_3(%arg0: i32, %arg1: i32, %arg2: i32) -> (i32, i32, i32, i32) {
    %c0_i32 = arith.constant 0 : i32
    %c0_i32_0 = arith.constant 0 : i32
    %c0_i32_1 = arith.constant 0 : i32
    return %arg0, %arg1, %c0_i32, %c0_i32_0 : i32, i32, i32, i32
  }
}

module attributes {stable_mosaic.version = 11 : i64} {
  func.func @_mm_ls_res_kernel(%arg0: i32, %arg1: i32, %arg2: memref<20x32xbf16, #tpu.memory_space<vmem>>, %arg3: memref<32x32xbf16, #tpu.memory_space<vmem>>, %arg4: memref<1x32xf32, #tpu.memory_space<vmem>>, %arg5: memref<1x32xf32, #tpu.memory_space<vmem>>, %arg6: memref<20x32xf32, #tpu.memory_space<vmem>>, %arg7: memref<20x32xf32, #tpu.memory_space<vmem>>) attributes {dimension_semantics = [#tpu.dimension_semantics<parallel>, #tpu.dimension_semantics<parallel>], iteration_bounds = array<i64: 1, 1>, scalar_prefetch = 0 : i64, scratch_operands = 0 : i64, tpu.core_type = #tpu.core_type<tc>, window_params = [{transform_indices = @transform_0, window_bounds = array<i64: 20, 32>}, {transform_indices = @transform_1, window_bounds = array<i64: 32, 32>}, {transform_indices = @transform_2, window_bounds = array<i64: 1, 32>}, {transform_indices = @transform_3, window_bounds = array<i64: 1, 32>}, {transform_indices = @transform_4, window_bounds = array<i64: 20, 32>}, {transform_indices = @transform_5, window_bounds = array<i64: 20, 32>}]} {
    %c0 = arith.constant 0 : index
    %c0_0 = arith.constant 0 : index
    %0 = vector.load %arg2[%c0, %c0_0] : memref<20x32xbf16, #tpu.memory_space<vmem>>, vector<20x32xbf16>
    %c0_1 = arith.constant 0 : index
    %c0_2 = arith.constant 0 : index
    %1 = vector.load %arg3[%c0_1, %c0_2] : memref<32x32xbf16, #tpu.memory_space<vmem>>, vector<32x32xbf16>
    %cst = arith.constant dense<0.000000e+00> : vector<20x32xf32>
    %2 = tpu.matmul %0, %1, %cst {dimension_numbers = #tpu.dot_dimension_numbers<[1], [0], [0], [1], [0, 0, 1, 1], [], []>} : vector<20x32xbf16>, vector<32x32xbf16>, vector<20x32xf32> -> vector<20x32xf32>
    %c0_3 = arith.constant 0 : index
    %c0_4 = arith.constant 0 : index
    %3 = vector.load %arg4[%c0_3, %c0_4] : memref<1x32xf32, #tpu.memory_space<vmem>>, vector<1x32xf32>
    %4 = vector.broadcast %3 : vector<1x32xf32> to vector<20x32xf32>
    %5 = arith.addf %2, %4 : vector<20x32xf32>
    %c0_5 = arith.constant 0 : index
    %c0_6 = arith.constant 0 : index
    %6 = vector.load %arg6[%c0_5, %c0_6] : memref<20x32xf32, #tpu.memory_space<vmem>>, vector<20x32xf32>
    %c0_7 = arith.constant 0 : index
    %c0_8 = arith.constant 0 : index
    %7 = vector.load %arg5[%c0_7, %c0_8] : memref<1x32xf32, #tpu.memory_space<vmem>>, vector<1x32xf32>
    %8 = vector.broadcast %7 : vector<1x32xf32> to vector<20x32xf32>
    %9 = arith.mulf %8, %5 : vector<20x32xf32>
    %10 = arith.addf %6, %9 : vector<20x32xf32>
    %c0_9 = arith.constant 0 : index
    %c0_10 = arith.constant 0 : index
    %11 = vector.load %arg7[%c0_9, %c0_10] : memref<20x32xf32, #tpu.memory_space<vmem>>, vector<20x32xf32>
    tpu.vector_store %arg7[%c0_9, %c0_10], %10 {strides = array<i32>} : memref<20x32xf32, #tpu.memory_space<vmem>>, vector<20x32xf32>,
    return
  }
  func.func @transform_0(%arg0: i32, %arg1: i32) -> (i32, i32) {
    %c0_i32 = arith.constant 0 : i32
    %c0_i32_0 = arith.constant 0 : i32
    return %arg0, %c0_i32 : i32, i32
  }
  func.func @transform_1(%arg0: i32, %arg1: i32) -> (i32, i32) {
    %c0_i32 = arith.constant 0 : i32
    %c0_i32_0 = arith.constant 0 : i32
    return %c0_i32, %arg1 : i32, i32
  }
  func.func @transform_2(%arg0: i32, %arg1: i32) -> (i32, i32) {
    %c0_i32 = arith.constant 0 : i32
    %c0_i32_0 = arith.constant 0 : i32
    return %c0_i32, %arg1 : i32, i32
  }
  func.func @transform_3(%arg0: i32, %arg1: i32) -> (i32, i32) {
    %c0_i32 = arith.constant 0 : i32
    %c0_i32_0 = arith.constant 0 : i32
    return %c0_i32, %arg1 : i32, i32
  }
  func.func @transform_4(%arg0: i32, %arg1: i32) -> (i32, i32) {
    %c0_i32 = arith.constant 0 : i32
    return %arg0, %arg1 : i32, i32
  }
  func.func @transform_5(%arg0: i32, %arg1: i32) -> (i32, i32) {
    %c0_i32 = arith.constant 0 : i32
    return %arg0, %arg1 : i32, i32
  }
}

module attributes {stable_mosaic.version = 11 : i64} {
  func.func @_ln_mm_kernel(%arg0: i32, %arg1: i32, %arg2: memref<20x32xf32, #tpu.memory_space<vmem>>, %arg3: memref<1x32xf32, #tpu.memory_space<vmem>>, %arg4: memref<1x32xf32, #tpu.memory_space<vmem>>, %arg5: memref<32x128xbf16, #tpu.memory_space<vmem>>, %arg6: memref<1x128xf32, #tpu.memory_space<vmem>>, %arg7: memref<20x128xbf16, #tpu.memory_space<vmem>>) attributes {dimension_semantics = [#tpu.dimension_semantics<parallel>, #tpu.dimension_semantics<parallel>], iteration_bounds = array<i64: 1, 1>, scalar_prefetch = 0 : i64, scratch_operands = 0 : i64, tpu.core_type = #tpu.core_type<tc>, window_params = [{transform_indices = @transform_0, window_bounds = array<i64: 20, 32>}, {pipeline_mode = #tpu.pipeline_mode<synchronous>, transform_indices = @transform_1, window_bounds = array<i64: 1, 32>}, {pipeline_mode = #tpu.pipeline_mode<synchronous>, transform_indices = @transform_2, window_bounds = array<i64: 1, 32>}, {transform_indices = @transform_3, window_bounds = array<i64: 32, 128>}, {transform_indices = @transform_4, window_bounds = array<i64: 1, 128>}, {transform_indices = @transform_5, window_bounds = array<i64: 20, 128>}]} {
    %c0 = arith.constant 0 : index
    %c0_0 = arith.constant 0 : index
    %0 = vector.load %arg2[%c0, %c0_0] : memref<20x32xf32, #tpu.memory_space<vmem>>, vector<20x32xf32>
    %cst = arith.constant dense<0.000000e+00> : vector<20xf32>
    %1 = vector.multi_reduction <add>, %0, %cst [1] : vector<20x32xf32> to vector<20xf32>
    %2 = vector.shape_cast %1 : vector<20xf32> to vector<20x1xf32>
    %cst_1 = arith.constant 3.200000e+01 : f32
    %3 = vector.broadcast %cst_1 : f32 to vector<20x1xf32>
    %4 = arith.divf %2, %3 : vector<20x1xf32>
    %5 = vector.broadcast %4 : vector<20x1xf32> to vector<20x32xf32>
    %6 = arith.subf %0, %5 : vector<20x32xf32>
    %7 = arith.mulf %6, %6 : vector<20x32xf32>
    %cst_2 = arith.constant dense<0.000000e+00> : vector<20xf32>
    %8 = vector.multi_reduction <add>, %7, %cst_2 [1] : vector<20x32xf32> to vector<20xf32>
    %9 = vector.shape_cast %8 : vector<20xf32> to vector<20x1xf32>
    %cst_3 = arith.constant 3.200000e+01 : f32
    %10 = vector.broadcast %cst_3 : f32 to vector<20x1xf32>
    %11 = arith.divf %9, %10 : vector<20x1xf32>
    %cst_4 = arith.constant 9.99999997E-7 : f32
    %12 = vector.broadcast %cst_4 : f32 to vector<20x1xf32>
    %13 = arith.addf %11, %12 : vector<20x1xf32>
    %14 = math.rsqrt %13 : vector<20x1xf32>
    %15 = vector.broadcast %14 : vector<20x1xf32> to vector<20x32xf32>
    %16 = arith.mulf %6, %15 : vector<20x32xf32>
    %c0_5 = arith.constant 0 : index
    %c0_6 = arith.constant 0 : index
    %17 = vector.load %arg3[%c0_5, %c0_6] : memref<1x32xf32, #tpu.memory_space<vmem>>, vector<1x32xf32>
    %18 = vector.broadcast %17 : vector<1x32xf32> to vector<20x32xf32>
    %19 = arith.mulf %16, %18 : vector<20x32xf32>
    %c0_7 = arith.constant 0 : index
    %c0_8 = arith.constant 0 : index
    %20 = vector.load %arg4[%c0_7, %c0_8] : memref<1x32xf32, #tpu.memory_space<vmem>>, vector<1x32xf32>
    %21 = vector.broadcast %20 : vector<1x32xf32> to vector<20x32xf32>
    %22 = arith.addf %19, %21 : vector<20x32xf32>
    %23 = arith.truncf %22 : vector<20x32xf32> to vector<20x32xbf16>
    %c0_9 = arith.constant 0 : index
    %c0_10 = arith.constant 0 : index
    %24 = vector.load %arg5[%c0_9, %c0_10] : memref<32x128xbf16, #tpu.memory_space<vmem>>, vector<32x128xbf16>
    %cst_11 = arith.constant dense<0.000000e+00> : vector<20x128xf32>
    %25 = tpu.matmul %23, %24, %cst_11 {dimension_numbers = #tpu.dot_dimension_numbers<[1], [0], [0], [1], [0, 0, 1, 1], [], []>} : vector<20x32xbf16>, vector<32x128xbf16>, vector<20x128xf32> -> vector<20x128xf32>
    %c0_12 = arith.constant 0 : index
    %c0_13 = arith.constant 0 : index
    %26 = vector.load %arg6[%c0_12, %c0_13] : memref<1x128xf32, #tpu.memory_space<vmem>>, vector<1x128xf32>
    %27 = vector.broadcast %26 : vector<1x128xf32> to vector<20x128xf32>
    %28 = arith.addf %25, %27 : vector<20x128xf32>
    %cst_14 = arith.constant 0.707106769 : f32
    %29 = vector.broadcast %cst_14 : f32 to vector<20x128xf32>
    %30 = arith.mulf %28, %29 : vector<20x128xf32>
    %cst_15 = arith.constant 0.000000e+00 : f32
    %31 = vector.broadcast %cst_15 : f32 to vector<20x128xf32>
    %32 = arith.cmpf oge, %30, %31 : vector<20x128xf32>
    %cst_16 = arith.constant 0.000000e+00 : f32
    %33 = vector.broadcast %cst_16 : f32 to vector<20x128xf32>
    %34 = arith.subf %33, %30 : vector<20x128xf32>
    %35 = arith.select %32, %30, %34 : vector<20x128xi1>, vector<20x128xf32>
    %cst_17 = arith.constant 0.327591091 : f32
    %36 = vector.broadcast %cst_17 : f32 to vector<20x128xf32>
    %37 = arith.mulf %36, %35 : vector<20x128xf32>
    %cst_18 = arith.constant 1.000000e+00 : f32
    %38 = vector.broadcast %cst_18 : f32 to vector<20x128xf32>
    %39 = arith.addf %38, %37 : vector<20x128xf32>
    %cst_19 = arith.constant 1.000000e+00 : f32
    %40 = vector.broadcast %cst_19 : f32 to vector<20x128xf32>
    %41 = arith.divf %40, %39 : vector<20x128xf32>
    %cst_20 = arith.constant 1.06140542 : f32
    %42 = vector.broadcast %cst_20 : f32 to vector<20x128xf32>
    %43 = arith.mulf %42, %41 : vector<20x128xf32>
    %cst_21 = arith.constant 1.45315206 : f32
    %44 = vector.broadcast %cst_21 : f32 to vector<20x128xf32>
    %45 = arith.subf %43, %44 : vector<20x128xf32>
    %46 = arith.mulf %45, %41 : vector<20x128xf32>
    %cst_22 = arith.constant 1.42141378 : f32
    %47 = vector.broadcast %cst_22 : f32 to vector<20x128xf32>
    %48 = arith.addf %46, %47 : vector<20x128xf32>
    %49 = arith.mulf %48, %41 : vector<20x128xf32>
    %cst_23 = arith.constant 0.284496725 : f32
    %50 = vector.broadcast %cst_23 : f32 to vector<20x128xf32>
    %51 = arith.subf %49, %50 : vector<20x128xf32>
    %52 = arith.mulf %51, %41 : vector<20x128xf32>
    %cst_24 = arith.constant 0.254829586 : f32
    %53 = vector.broadcast %cst_24 : f32 to vector<20x128xf32>
    %54 = arith.addf %52, %53 : vector<20x128xf32>
    %55 = arith.mulf %54, %41 : vector<20x128xf32>
    %cst_25 = arith.constant 0.000000e+00 : f32
    %56 = vector.broadcast %cst_25 : f32 to vector<20x128xf32>
    %57 = arith.subf %56, %35 : vector<20x128xf32>
    %58 = arith.mulf %57, %35 : vector<20x128xf32>
    %59 = math.exp %58 : vector<20x128xf32>
    %60 = arith.mulf %55, %59 : vector<20x128xf32>
    %cst_26 = arith.constant 1.000000e+00 : f32
    %61 = vector.broadcast %cst_26 : f32 to vector<20x128xf32>
    %62 = arith.subf %61, %60 : vector<20x128xf32>
    %cst_27 = arith.constant 0.000000e+00 : f32
    %63 = vector.broadcast %cst_27 : f32 to vector<20x128xf32>
    %64 = arith.cmpf oge, %30, %63 : vector<20x128xf32>
    %cst_28 = arith.constant 0.000000e+00 : f32
    %65 = vector.broadcast %cst_28 : f32 to vector<20x128xf32>
    %66 = arith.subf %65, %62 : vector<20x128xf32>
    %67 = arith.select %64, %62, %66 : vector<20x128xi1>, vector<20x128xf32>
    %cst_29 = arith.constant 5.000000e-01 : f32
    %68 = vector.broadcast %cst_29 : f32 to vector<20x128xf32>
    %69 = arith.mulf %68, %28 : vector<20x128xf32>
    %cst_30 = arith.constant 1.000000e+00 : f32
    %70 = vector.broadcast %cst_30 : f32 to vector<20x128xf32>
    %71 = arith.addf %70, %67 : vector<20x128xf32>
    %72 = arith.mulf %69, %71 : vector<20x128xf32>
    %73 = arith.truncf %72 : vector<20x128xf32> to vector<20x128xbf16>
    %c0_31 = arith.constant 0 : index
    %c0_32 = arith.constant 0 : index
    %74 = vector.load %arg7[%c0_31, %c0_32] : memref<20x128xbf16, #tpu.memory_space<vmem>>, vector<20x128xbf16>
    tpu.vector_store %arg7[%c0_31, %c0_32], %73 {strides = array<i32>} : memref<20x128xbf16, #tpu.memory_space<vmem>>, vector<20x128xbf16>,
    return
  }
  func.func @transform_0(%arg0: i32, %arg1: i32) -> (i32, i32) {
    %c0_i32 = arith.constant 0 : i32
    %c0_i32_0 = arith.constant 0 : i32
    return %arg0, %c0_i32 : i32, i32
  }
  func.func @transform_1(%arg0: i32, %arg1: i32) -> (i32, i32) {
    %c0_i32 = arith.constant 0 : i32
    %c0_i32_0 = arith.constant 0 : i32
    %c0_i32_1 = arith.constant 0 : i32
    return %c0_i32, %c0_i32_0 : i32, i32
  }
  func.func @transform_2(%arg0: i32, %arg1: i32) -> (i32, i32) {
    %c0_i32 = arith.constant 0 : i32
    %c0_i32_0 = arith.constant 0 : i32
    %c0_i32_1 = arith.constant 0 : i32
    return %c0_i32, %c0_i32_0 : i32, i32
  }
  func.func @transform_3(%arg0: i32, %arg1: i32) -> (i32, i32) {
    %c0_i32 = arith.constant 0 : i32
    %c0_i32_0 = arith.constant 0 : i32
    return %c0_i32, %arg1 : i32, i32
  }
  func.func @transform_4(%arg0: i32, %arg1: i32) -> (i32, i32) {
    %c0_i32 = arith.constant 0 : i32
    %c0_i32_0 = arith.constant 0 : i32
    return %c0_i32, %arg1 : i32, i32
  }
  func.func @transform_5(%arg0: i32, %arg1: i32) -> (i32, i32) {
    %c0_i32 = arith.constant 0 : i32
    return %arg0, %arg1 : i32, i32
  }
}

module attributes {stable_mosaic.version = 11 : i64} {
  func.func @_mm_ls_res_kernel(%arg0: i32, %arg1: i32, %arg2: memref<20x128xbf16, #tpu.memory_space<vmem>>, %arg3: memref<128x32xbf16, #tpu.memory_space<vmem>>, %arg4: memref<1x32xf32, #tpu.memory_space<vmem>>, %arg5: memref<1x32xf32, #tpu.memory_space<vmem>>, %arg6: memref<20x32xf32, #tpu.memory_space<vmem>>, %arg7: memref<20x32xf32, #tpu.memory_space<vmem>>) attributes {dimension_semantics = [#tpu.dimension_semantics<parallel>, #tpu.dimension_semantics<parallel>], iteration_bounds = array<i64: 1, 1>, scalar_prefetch = 0 : i64, scratch_operands = 0 : i64, tpu.core_type = #tpu.core_type<tc>, window_params = [{transform_indices = @transform_0, window_bounds = array<i64: 20, 128>}, {transform_indices = @transform_1, window_bounds = array<i64: 128, 32>}, {transform_indices = @transform_2, window_bounds = array<i64: 1, 32>}, {transform_indices = @transform_3, window_bounds = array<i64: 1, 32>}, {transform_indices = @transform_4, window_bounds = array<i64: 20, 32>}, {transform_indices = @transform_5, window_bounds = array<i64: 20, 32>}]} {
    %c0 = arith.constant 0 : index
    %c0_0 = arith.constant 0 : index
    %0 = vector.load %arg2[%c0, %c0_0] : memref<20x128xbf16, #tpu.memory_space<vmem>>, vector<20x128xbf16>
    %c0_1 = arith.constant 0 : index
    %c0_2 = arith.constant 0 : index
    %1 = vector.load %arg3[%c0_1, %c0_2] : memref<128x32xbf16, #tpu.memory_space<vmem>>, vector<128x32xbf16>
    %cst = arith.constant dense<0.000000e+00> : vector<20x32xf32>
    %2 = tpu.matmul %0, %1, %cst {dimension_numbers = #tpu.dot_dimension_numbers<[1], [0], [0], [1], [0, 0, 1, 1], [], []>} : vector<20x128xbf16>, vector<128x32xbf16>, vector<20x32xf32> -> vector<20x32xf32>
    %c0_3 = arith.constant 0 : index
    %c0_4 = arith.constant 0 : index
    %3 = vector.load %arg4[%c0_3, %c0_4] : memref<1x32xf32, #tpu.memory_space<vmem>>, vector<1x32xf32>
    %4 = vector.broadcast %3 : vector<1x32xf32> to vector<20x32xf32>
    %5 = arith.addf %2, %4 : vector<20x32xf32>
    %c0_5 = arith.constant 0 : index
    %c0_6 = arith.constant 0 : index
    %6 = vector.load %arg6[%c0_5, %c0_6] : memref<20x32xf32, #tpu.memory_space<vmem>>, vector<20x32xf32>
    %c0_7 = arith.constant 0 : index
    %c0_8 = arith.constant 0 : index
    %7 = vector.load %arg5[%c0_7, %c0_8] : memref<1x32xf32, #tpu.memory_space<vmem>>, vector<1x32xf32>
    %8 = vector.broadcast %7 : vector<1x32xf32> to vector<20x32xf32>
    %9 = arith.mulf %8, %5 : vector<20x32xf32>
    %10 = arith.addf %6, %9 : vector<20x32xf32>
    %c0_9 = arith.constant 0 : index
    %c0_10 = arith.constant 0 : index
    %11 = vector.load %arg7[%c0_9, %c0_10] : memref<20x32xf32, #tpu.memory_space<vmem>>, vector<20x32xf32>
    tpu.vector_store %arg7[%c0_9, %c0_10], %10 {strides = array<i32>} : memref<20x32xf32, #tpu.memory_space<vmem>>, vector<20x32xf32>,
    return
  }
  func.func @transform_0(%arg0: i32, %arg1: i32) -> (i32, i32) {
    %c0_i32 = arith.constant 0 : i32
    %c0_i32_0 = arith.constant 0 : i32
    return %arg0, %c0_i32 : i32, i32
  }
  func.func @transform_1(%arg0: i32, %arg1: i32) -> (i32, i32) {
    %c0_i32 = arith.constant 0 : i32
    %c0_i32_0 = arith.constant 0 : i32
    return %c0_i32, %arg1 : i32, i32
  }
  func.func @transform_2(%arg0: i32, %arg1: i32) -> (i32, i32) {
    %c0_i32 = arith.constant 0 : i32
    %c0_i32_0 = arith.constant 0 : i32
    return %c0_i32, %arg1 : i32, i32
  }
  func.func @transform_3(%arg0: i32, %arg1: i32) -> (i32, i32) {
    %c0_i32 = arith.constant 0 : i32
    %c0_i32_0 = arith.constant 0 : i32
    return %c0_i32, %arg1 : i32, i32
  }
  func.func @transform_4(%arg0: i32, %arg1: i32) -> (i32, i32) {
    %c0_i32 = arith.constant 0 : i32
    return %arg0, %arg1 : i32, i32
  }
  func.func @transform_5(%arg0: i32, %arg1: i32) -> (i32, i32) {
    %c0_i32 = arith.constant 0 : i32
    return %arg0, %arg1 : i32, i32
  }
}

module attributes {stable_mosaic.version = 11 : i64} {
  func.func @_layernorm_kernel(%arg0: i32, %arg1: memref<2x32xf32, #tpu.memory_space<vmem>>, %arg2: memref<1x32xf32, #tpu.memory_space<vmem>>, %arg3: memref<1x32xf32, #tpu.memory_space<vmem>>, %arg4: memref<2x32xf32, #tpu.memory_space<vmem>>) attributes {dimension_semantics = [#tpu.dimension_semantics<parallel>], iteration_bounds = array<i64: 1>, scalar_prefetch = 0 : i64, scratch_operands = 0 : i64, tpu.core_type = #tpu.core_type<tc>, window_params = [{transform_indices = @transform_0, window_bounds = array<i64: 2, 32>}, {pipeline_mode = #tpu.pipeline_mode<synchronous>, transform_indices = @transform_1, window_bounds = array<i64: 1, 32>}, {pipeline_mode = #tpu.pipeline_mode<synchronous>, transform_indices = @transform_2, window_bounds = array<i64: 1, 32>}, {transform_indices = @transform_3, window_bounds = array<i64: 2, 32>}]} {
    %c0 = arith.constant 0 : index
    %c0_0 = arith.constant 0 : index
    %0 = vector.load %arg1[%c0, %c0_0] : memref<2x32xf32, #tpu.memory_space<vmem>>, vector<2x32xf32>
    %cst = arith.constant dense<0.000000e+00> : vector<2xf32>
    %1 = vector.multi_reduction <add>, %0, %cst [1] : vector<2x32xf32> to vector<2xf32>
    %2 = vector.shape_cast %1 : vector<2xf32> to vector<2x1xf32>
    %cst_1 = arith.constant 3.200000e+01 : f32
    %3 = vector.broadcast %cst_1 : f32 to vector<2x1xf32>
    %4 = arith.divf %2, %3 : vector<2x1xf32>
    %5 = vector.broadcast %4 : vector<2x1xf32> to vector<2x32xf32>
    %6 = arith.subf %0, %5 : vector<2x32xf32>
    %7 = arith.mulf %6, %6 : vector<2x32xf32>
    %cst_2 = arith.constant dense<0.000000e+00> : vector<2xf32>
    %8 = vector.multi_reduction <add>, %7, %cst_2 [1] : vector<2x32xf32> to vector<2xf32>
    %9 = vector.shape_cast %8 : vector<2xf32> to vector<2x1xf32>
    %cst_3 = arith.constant 3.200000e+01 : f32
    %10 = vector.broadcast %cst_3 : f32 to vector<2x1xf32>
    %11 = arith.divf %9, %10 : vector<2x1xf32>
    %cst_4 = arith.constant 9.99999997E-7 : f32
    %12 = vector.broadcast %cst_4 : f32 to vector<2x1xf32>
    %13 = arith.addf %11, %12 : vector<2x1xf32>
    %14 = math.rsqrt %13 : vector<2x1xf32>
    %15 = vector.broadcast %14 : vector<2x1xf32> to vector<2x32xf32>
    %16 = arith.mulf %6, %15 : vector<2x32xf32>
    %c0_5 = arith.constant 0 : index
    %c0_6 = arith.constant 0 : index
    %17 = vector.load %arg2[%c0_5, %c0_6] : memref<1x32xf32, #tpu.memory_space<vmem>>, vector<1x32xf32>
    %18 = vector.broadcast %17 : vector<1x32xf32> to vector<2x32xf32>
    %19 = arith.mulf %16, %18 : vector<2x32xf32>
    %c0_7 = arith.constant 0 : index
    %c0_8 = arith.constant 0 : index
    %20 = vector.load %arg3[%c0_7, %c0_8] : memref<1x32xf32, #tpu.memory_space<vmem>>, vector<1x32xf32>
    %21 = vector.broadcast %20 : vector<1x32xf32> to vector<2x32xf32>
    %22 = arith.addf %19, %21 : vector<2x32xf32>
    %c0_9 = arith.constant 0 : index
    %c0_10 = arith.constant 0 : index
    %23 = vector.load %arg4[%c0_9, %c0_10] : memref<2x32xf32, #tpu.memory_space<vmem>>, vector<2x32xf32>
    tpu.vector_store %arg4[%c0_9, %c0_10], %22 {strides = array<i32>} : memref<2x32xf32, #tpu.memory_space<vmem>>, vector<2x32xf32>,
    return
  }
  func.func @transform_0(%arg0: i32) -> (i32, i32) {
    %c0_i32 = arith.constant 0 : i32
    %c0_i32_0 = arith.constant 0 : i32
    return %arg0, %c0_i32 : i32, i32
  }
  func.func @transform_1(%arg0: i32) -> (i32, i32) {
    %c0_i32 = arith.constant 0 : i32
    %c0_i32_0 = arith.constant 0 : i32
    %c0_i32_1 = arith.constant 0 : i32
    return %c0_i32, %c0_i32_0 : i32, i32
  }
  func.func @transform_2(%arg0: i32) -> (i32, i32) {
    %c0_i32 = arith.constant 0 : i32
    %c0_i32_0 = arith.constant 0 : i32
    %c0_i32_1 = arith.constant 0 : i32
    return %c0_i32, %c0_i32_0 : i32, i32
  }
  func.func @transform_3(%arg0: i32) -> (i32, i32) {
    %c0_i32 = arith.constant 0 : i32
    %c0_i32_0 = arith.constant 0 : i32
    return %arg0, %c0_i32 : i32, i32
  }
}

</mosaic_0001>

<bundles_post_ra>
// kernel: vit_wrapper_forward.12
= control target key start
LH: loop header
LB: loop body
LE: loop exit
PB: predicated region body
PF: predicated region fallthrough
CT: control target
= control target key end

     0   :  { %vm133_vm0 = vcmask 523264   ;;  %vm176_vm1 = vcmask 261120   ;;  %vm179_vm2 = vcmask 254976   ;;  %s351_s1 = inlined_call_operand.vmem [shape: bf16[192,32], index: 1, kind: input, shape index: {}]   ;;  %s352_s0 = inlined_call_operand.vmem [shape: bf16[18,192], index: 0, kind: input, shape index: {}]   ;;  %s353_s2 = inlined_call_operand.vmem [shape: f32[1,32], index: 2, kind: input, shape index: {}]   ;;  %s354_s3 = inlined_call_operand.vmem [shape: f32[18,32], index: 3, kind: output, shape index: {}]  }
   0x1   :  { %v252_v0 = vld [vmem:[%s351_s1 + $0x38] sm:$0xff]  ;;  %v251_v2 = vld [vmem:[%s351_s1 + $0x30] sm:$0xff]  ;;  %v250_v4 = vld [vmem:[%s351_s1 + $0x28] sm:$0xff] }
   0x2   :  { %v256_v1 = vld [vmem:[%s351_s1 + $0x58] sm:$0xff]  ;;  %140 = vmatpush.bf16.msra.mxu0 %v252_v0  ;;  %257 = vmatpush.bf16.msra.mxu2 %v252_v0  ;;  %v255_v3 = vld [vmem:[%s351_s1 + $0x50] sm:$0xff]  ;;  %v254_v5 = vld [vmem:[%s351_s1 + $0x48] sm:$0xff] }
   0x3   :  { %162 = vmatpush.bf16.msra.mxu1 %v256_v1  ;;  %v249_v6 = vld [vmem:[%s351_s1 + $0x20] sm:$0xff]  ;;  %v189_v9 = vld [vmem:[%s352_s0 + $0x8] sm:$0xf0]  ;;  %v248_v11 = vld [vmem:[%s351_s1 + $0x18] sm:$0xff] }
   0x4   :  { %v253_v7 = vld [vmem:[%s351_s1 + $0x40] sm:$0xff]  ;;  %v247_v12 = vld [vmem:[%s351_s1 + $0x10] sm:$0xff]  ;;  %v246_v13 = vld [vmem:[%s351_s1 + $0x8] sm:$0xff] }
   0x5   :  { %v243_v8 = vld [vmem:[%s352_s0 + $0x4] sm:$0xf]  ;;  %v17_v14 = vld [vmem:[%s352_s0 + $0x10] sm:$0x11]  ;;  %v187_v16 = vld [vmem:[%s352_s0] sm:$0xf] }
   0x6   :  { %141 = vmatpush.bf16.msra.mxu0 %v251_v2  ;;  %258 = vmatpush.bf16.msra.mxu2 %v251_v2  ;;  %v192_v10 = vor.u32 %v243_v8, %v189_v9  ;;  %v245_v15 = vld [vmem:[%s351_s1] sm:$0xff]  ;;  %v244_v17 = vld [vmem:[%s352_s0 + $0x4] sm:$0xf0]  ;;  %v53_v18 = vunpack.c.l.b16 %v17_v14  ;;  %v54_v19 = vunpack.c.h.b16 %v17_v14 }
   0x7   :  { %163 = vmatpush.bf16.msra.mxu1 %v255_v3  ;;  %v188_v20 = vor.u32 %v244_v17, %v187_v16  ;;  %v265_v25 = vld [vmem:[%s353_s2] ss:$0 sm:$0xff] }
   0x8   :  { %v57_v21 = vpack.c.b16 %v53_v18, %v53_v18  ;;  %v58_v22 = vpack.c.b16 %v54_v19, %v54_v19 }
   0xa   :  { %142 = vmatpush.bf16.msra.mxu0 %v250_v4  ;;  %259 = vmatpush.bf16.msra.mxu2 %v250_v4 }
   0xb   :  { %164 = vmatpush.bf16.msra.mxu1 %v254_v5 }
   0xe   :  { %143 = vmatpush.bf16.msra.mxu0 %v249_v6  ;;  %260 = vmatpush.bf16.msra.mxu2 %v249_v6 }
   0xf   :  { %165 = vmatpush.bf16.msra.mxu1 %v253_v7 }
  0x12   :  { %241 = vmatmul.msk.bf16.vlgmr.msra.gmra.mxu1 %vm133_vm0, %v192_v10  ;;  %144 = vmatpush.bf16.msra.mxu0 %v248_v11 }
  0x13   :  { %261 = vmatpush.bf16.msra.mxu2 %v248_v11 }
  0x16   :  { %145 = vmatpush.bf16.msra.mxu0 %v247_v12 }
  0x17   :  { %262 = vmatpush.bf16.msra.mxu2 %v247_v12 }
  0x1a   :  { %146 = vmatpush.bf16.msra.mxu0 %v246_v13 }
  0x1b   :  { %263 = vmatpush.bf16.msra.mxu2 %v246_v13 }
  0x1e   :  { %147 = vmatpush.bf16.msra.mxu0 %v245_v15 }
  0x1f   :  { %264 = vmatpush.bf16.msra.mxu2 %v245_v15 }
  0x21   :  { %148 = vmatmul.bf16.vlgmr.msra.gmra.mxu0 %v188_v20 }
  0x22   :  { %153 = vmatmul.bf16.vlgmr.msra.gmra.mxu2 %v57_v21  ;;  %242 = vmatmul.msk.bf16.gmra.mxu1 %vm133_vm0, %v58_v22 }
  0x8f   :  { %v167_v23 = vpop.f32.mrf.mxu1 }
  0x97   :  { %v169_v24 = vpop.f32.mrf.mxu1 }
  0x9e   :  { %v149_v26 = vpop.f32.mrf.mxu0 }
  0x9f   :  { %v150_v27 = vadd.f32 %v265_v25, %v149_v26  ;;  %v172_v28 = vpop.f32.mrf.mxu1 }
  0xa1   :  { %v168_v29 = vadd.f32 %v167_v23, %v150_v27 }
  0xa3   :  { %177 = vst.msk [vmem:[%s354_s3] sm:$0xff] %vm176_vm1, %v168_v29 }
  0xa5   :  { %v154_v30 = vpop.f32.mrf.mxu2 }
  0xa6   :  { %v155_v31 = vadd.f32 %v265_v25, %v154_v30  ;;  %v151_v32 = vpop.f32.mrf.mxu0 }
  0xa7   :  { %v152_v33 = vadd.f32 %v265_v25, %v151_v32  ;;  %v174_v34 = vpop.f32.mrf.mxu1 }
  0xa8   :  { %v173_v35 = vadd.f32 %v172_v28, %v155_v31 }
  0xa9   :  { %v170_v36 = vadd.f32 %v169_v24, %v152_v33 }
  0xaa   :  { %180 = vst.msk [vmem:[%s354_s3 + $0x10] sm:$0x3] %vm179_vm2, %v173_v35 }
  0xab   :  { %178 = vst.msk [vmem:[%s354_s3 + $0x8] sm:$0xff] %vm176_vm1, %v170_v36 }
  0xad   :  { %v156_v37 = vpop.f32.mrf.mxu2 }

// kernel: vit_wrapper_forward.13
= control target key start
LH: loop header
LB: loop body
LE: loop exit
PB: predicated region body
PF: predicated region fallthrough
CT: control target
= control target key end

     0   :  { %vm24_vm0 = vcmask 261120   ;;  %vm31_vm1 = vcmask 257024   ;;  %v197_v6 = vmov 32.0   ;;  %vm162_vm12 = vcmask 781312   ;;  %s274_s0 = inlined_call_operand.vmem [shape: f32[20,32], index: 0, kind: input, shape index: {}]   ;;  %s275_s1 = inlined_call_operand.vmem [shape: f32[1,32], index: 1, kind: input, shape index: {}]   ;;  %s276_s2 = inlined_call_operand.vmem [shape: f32[1,32], index: 2, kind: input, shape index: {}]   ;;  %s277_s4 = inlined_call_operand.vmem [shape: f32[1,96], index: 4, kind: input, shape index: {}]   ;;  %s278_s3 = inlined_call_operand.vmem [shape: bf16[32,96], index: 3, kind: input, shape index: {}]   ;;  %s279_s5 = inlined_call_operand.vmem [shape: bf16[20,96], index: 5, kind: output, shape index: {}]  }
   0x1   :  { %v21_v0 = vld [vmem:[%s274_s0] sm:$0xff]  ;;  %v23_v1 = vld [vmem:[%s274_s0 + $0x10] sm:$0xf]  ;;  %v22_v4 = vld [vmem:[%s274_s0 + $0x8] sm:$0xff]  ;;  %189 = vrcp.f32 %v197_v6  ;;  %vm165_vm13 = vcmask 779264  }
   0x2   :  { %v25_v2 = vsel %vm24_vm0, %v21_v0, 0.0  ;;  %v32_v3 = vsel %vm31_vm1, %v23_v1, 0.0  ;;  %v28_v5 = vsel %vm24_vm0, %v22_v4, 0.0  ;;  %v182_v28 = vld [vmem:[%s278_s3 + $0x8] sm:$0xff]  ;;  %v181_v31 = vld [vmem:[%s278_s3] sm:$0xff] }
   0x3   :  { %26 = vadd.xlane.f32.xlu0 %v25_v2  ;;  %33 = vadd.xlane.f32.xlu1 %v32_v3  ;;  %v186_v53 = vld [vmem:[%s275_s1] ss:$0 sm:$0xff] }
   0x4   :  { %147 = vmatpush.bf16.msra.mxu0 %v182_v28  ;;  %183 = vmatpush.bf16.msra.mxu1 %v182_v28  ;;  %v187_v60 = vld [vmem:[%s276_s2] ss:$0 sm:$0xff] }
   0x7   :  { %v190_v7 = vpop.eup %189 }
   0x8   :  { %v36_v8 = vmul.f32 32.0, %v190_v7  ;;  %vm40_vm2 = vweird.f32 %v190_v7  ;;  %148 = vmatpush.bf16.msra.mxu0 %v181_v31  ;;  %184 = vmatpush.bf16.msra.mxu1 %v181_v31 }
   0xa   :  { %v37_v9 = vsub.f32 1.0, %v36_v8 }
   0xb   :  { %29 = vadd.xlane.f32.xlu0 %v28_v5 }
   0xc   :  { %v38_v10 = vmul.f32 %v190_v7, %v37_v9  ;;  %v188_v9 = vld [vmem:[%s277_s4] ss:$0 sm:$0xff] }
   0xe   :  { %v39_v11 = vadd.f32 %v190_v7, %v38_v10 }
  0x10   :  { %v41_v12 = vsel %vm40_vm2, %v190_v7, %v39_v11 }
  0x76   :  { %v27_v13 = vpop.xlane.xlu0 %26  ;;  %v34_v17 = vpop.xlane.xlu1 %33 }
  0x77   :  { %v42_v14 = vmul.f32 %v41_v12, %v27_v13  ;;  %v44_v21 = vmul.f32 %v41_v12, %v34_v17 }
  0x79   :  { %v45_v15 = vsub.f32 %v21_v0, %v42_v14  ;;  %v241_v23 = vsub.f32 %v23_v1, %v44_v21 }
  0x7b   :  { %v48_v16 = vmul.f32 %v45_v15, %v45_v15  ;;  %v50_v26 = vmul.f32 %v241_v23, %v241_v23 }
  0x7d   :  { %v51_v18 = vsel %vm24_vm0, %v48_v16, 0.0  ;;  %v57_v27 = vsel %vm31_vm1, %v50_v26, 0.0 }
  0x7e   :  { %52 = vadd.xlane.f32.xlu1 %v51_v18  ;;  %v30_v19 = vpop.xlane.xlu0 %29 }
  0x7f   :  { %v43_v20 = vmul.f32 %v41_v12, %v30_v19 }
  0x81   :  { %v46_v22 = vsub.f32 %v22_v4, %v43_v20 }
  0x83   :  { %v49_v24 = vmul.f32 %v46_v22, %v46_v22 }
  0x85   :  { %v54_v25 = vsel %vm24_vm0, %v49_v24, 0.0 }
  0x86   :  { %55 = vadd.xlane.f32.xlu2 %v54_v25 }
  0x8e   :  { %58 = vadd.xlane.f32.xlu2 %v57_v27 }
  0xf1   :  { %v53_v29 = vpop.xlane.xlu1 %52 }
  0xf2   :  { %v60_v30 = vmul.f32 %v53_v29, %v41_v12 }
  0xf4   :  { %v63_v32 = vadd.f32 1e-06, %v60_v30 }
  0xf6   :  { %191 = vrsqrt.f32 %v63_v32  ;;  %vm72_vm4 = vweird.f32 %v63_v32 }
  0xf9   :  { %v56_v33 = vpop.xlane.xlu2 %55 }
  0xfa   :  { %v61_v34 = vmul.f32 %v56_v33, %v41_v12 }
  0xfc   :  { %v192_v35 = vpop.eup %191  ;;  %v64_v36 = vadd.f32 1e-06, %v61_v34 }
  0xfd   :  { %v67_v37 = vmul.f32 %v192_v35, %v63_v32  ;;  %vm73_vm3 = vweird.f32 %v192_v35 }
  0xfe   :  { %193 = vrsqrt.f32 %v64_v36  ;;  %vm74_vm5 = vmor %vm72_vm4, %vm73_vm3  ;;  %vm82_vm7 = vweird.f32 %v64_v36 }
  0xff   :  { %v68_v38 = vmul.f32 %v192_v35, %v67_v37 }
 0x101   :  { %v69_v39 = vmul.f32 0.5, %v68_v38  ;;  %v59_v40 = vpop.xlane.xlu2 %58 }
 0x102   :  { %v62_v41 = vmul.f32 %v59_v40, %v41_v12 }
 0x103   :  { %v70_v42 = vsub.f32 1.5, %v69_v39 }
 0x104   :  { %v194_v43 = vpop.eup %193  ;;  %v65_v44 = vadd.f32 1e-06, %v62_v41 }
 0x105   :  { %v71_v45 = vmul.f32 %v192_v35, %v70_v42  ;;  %v77_v46 = vmul.f32 %v194_v43, %v64_v36  ;;  %vm83_vm6 = vweird.f32 %v194_v43 }
 0x106   :  { %195 = vrsqrt.f32 %v65_v44  ;;  %vm84_vm8 = vmor %vm82_vm7, %vm83_vm6  ;;  %vm92_vm10 = vweird.f32 %v65_v44 }
 0x107   :  { %v78_v47 = vmul.f32 %v194_v43, %v77_v46  ;;  %v75_v48 = vsel %vm74_vm5, %v192_v35, %v71_v45 }
 0x108   :  { %v96_v52 = vmul.f32 %v75_v48, %v45_v15 }
 0x109   :  { %v79_v49 = vmul.f32 0.5, %v78_v47 }
 0x10a   :  { %v103_v59 = vmul.f32 %v186_v53, %v96_v52 }
 0x10b   :  { %v80_v50 = vsub.f32 1.5, %v79_v49 }
 0x10c   :  { %v196_v51 = vpop.eup %195  ;;  %v110_v0 = vadd.f32 %v187_v60, %v103_v59 }
 0x10d   :  { %v81_v54 = vmul.f32 %v194_v43, %v80_v50  ;;  %v87_v55 = vmul.f32 %v196_v51, %v65_v44  ;;  %vm93_vm9 = vweird.f32 %v196_v51 }
 0x10e   :  { %vm94_vm11 = vmor %vm92_vm10, %vm93_vm9 }
 0x10f   :  { %v85_v56 = vsel %vm84_vm8, %v194_v43, %v81_v54  ;;  %v88_v57 = vmul.f32 %v196_v51, %v87_v55 }
 0x110   :  { %v97_v58 = vmul.f32 %v85_v56, %v46_v22 }
 0x111   :  { %v89_v61 = vmul.f32 0.5, %v88_v57 }
 0x112   :  { %v104_v62 = vmul.f32 %v186_v53, %v97_v58 }
 0x113   :  { %v90_v63 = vsub.f32 1.5, %v89_v61 }
 0x114   :  { %v111_v1 = vadd.f32 %v187_v60, %v104_v62 }
 0x115   :  { %v91_v2 = vmul.f32 %v196_v51, %v90_v63 }
 0x116   :  { %v113_v3 = vpack.c.bf16 %v111_v1, %v110_v0 }
 0x117   :  { %v95_v4 = vsel %vm94_vm11, %v196_v51, %v91_v2 }
 0x118   :  { %179 = vmatmul.msk.bf16.vlgmr.msra.gmra.mxu0 %vm24_vm0, %v113_v3  ;;  %v98_v5 = vmul.f32 %v95_v4, %v241_v23 }
 0x11a   :  { %v105_v6 = vmul.f32 %v186_v53, %v98_v5 }
 0x11c   :  { %v112_v7 = vadd.f32 %v187_v60, %v105_v6 }
 0x11e   :  { %v114_v8 = vpack.c.bf16 %v112_v7, %v112_v7 }
 0x120   :  { %180 = vmatmul.msk.bf16.vlgmr.msra.gmra.mxu1 %vm24_vm0, %v114_v8 }
 0x195   :  { %v150_v10 = vpop.f32.mrf.mxu0 }
 0x196   :  { %v151_v11 = vadd.f32 %v188_v9, %v150_v10 }
 0x198   :  { %v159_v12 = vpack.c.bf16 %v151_v11, %v151_v11 }
 0x19a   :  { %163 = vst.msk [vmem:[%s279_s5] sm:$0xf] %vm162_vm12, %v159_v12 }
 0x19d   :  { %v152_v13 = vpop.f32.mrf.mxu0  ;;  %v155_v14 = vpop.f32.mrf.mxu1 }
 0x19e   :  { %v153_v15 = vadd.f32 %v188_v9, %v152_v13  ;;  %v156_v16 = vadd.f32 %v188_v9, %v155_v14 }
 0x1a0   :  { %v160_v17 = vpack.c.bf16 %v153_v15, %v153_v15  ;;  %v161_v18 = vpack.c.bf16 %v156_v16, %v156_v16 }
 0x1a2   :  { %164 = vst.msk [vmem:[%s279_s5 + $0x4] sm:$0xf] %vm162_vm12, %v160_v17 }
 0x1a3   :  { %166 = vst.msk [vmem:[%s279_s5 + $0x8] sm:$0x3] %vm165_vm13, %v161_v18 }
 0x1a5   :  { %v157_v19 = vpop.f32.mrf.mxu1 }

// kernel: vit_wrapper_forward.14
= control target key start
LH: loop header
LB: loop body
LE: loop exit
PB: predicated region body
PF: predicated region fallthrough
CT: control target
= control target key end

     0   :  { %s801_s12 = smov 0   ;;  %s803_s13 = smov 0   ;;  %s894_s0 = inlined_call_operand.vmem [shape: bf16[2,12,10,8], index: 0, kind: input, shape index: {}, may-alias: {0,1,2}]   ;;  %s895_s1 = inlined_call_operand.vmem [shape: bf16[2,12,10,8], index: 1, kind: input, shape index: {}, may-alias: {0,1,2}]   ;;  %s896_s2 = inlined_call_operand.vmem [shape: bf16[2,12,10,8], index: 2, kind: input, shape index: {}, may-alias: {0,1,2}]   ;;  %s897_s3 = inlined_call_operand.vmem [shape: bf16[2,4,10,8], index: 3, kind: output, shape index: {}]  }
   0x1   :  { %s805_s14 = smov 0   ;;  %s807_s15 = smov 0  }
   0x2   :  { %s809_s16 = smov 0  }
   0x3 LB: > { %s28_s17 = sadd.s32 1, %s768_s14  ;;  %s32_s18 = sadd.s32 1, %s772_s15  ;;  %s776_s16 = sphi %s809_s16, %s13_s16   ;;  %s772_s15 = sphi %s807_s15, %s901_s15   ;;  %s768_s14 = sphi %s805_s14, %s900_s14   ;;  %s764_s13 = sphi %s803_s13, %s899_s13   ;;  %s760_s12 = sphi %s801_s12, %s898_s12  }
   0x4   : > { %p30_p0 = scmp.ge.s32.totalorder %s28_s17, 4  ;;  %p655_p1 = scmp.ge.s32.totalorder %s776_s16, 1 }
   0x5   : > { %p218_p2 = scmp.lt.s32.totalorder %s776_s16, 9 }
   0x6   : > { %s903_s17 = smov (%p30_p0, %s28_s17), 0  ;;  %s905_s18 = smov (!%p30_p0, %s32_s18), %s772_s15 }
   0x7   : > { %p219_p3 = pnand %p655_p1, %p218_p2  ;;  %p34_p4 = scmp.ge.s32.totalorder %s905_s18, 2 }
   0x8   : > { %p278_p5 = scmp.lt.s32.totalorder (!%p219_p3), %s764_s13, 1  ;;  %s287_s19 = sadd.s32 (!%p219_p3), 4, %s760_s12 }
   0x9   : > { %s907_s18 = smov (%p34_p4, %s905_s18), 0  ;;  %222 = sbr.rel (%p219_p3) target bundleno = 664 (0x298), region = 32 }
   0xa   : > { %p291_p6 = scmp.lt.s32.totalorder (!%p219_p3), %s287_s19, 11  ;;  %p280_p7 = scmp.lt.s32.totalorder (!%p219_p3), %s760_s12, 11 }
   0xb   : > { %s303_s7 = sadd.s32 (!%p219_p3), 8, %s760_s12  ;;  %p321_p9 = scmp.lt.s32.totalorder (!%p219_p3), %s760_s12, 3 }
   0xc   : > { %p307_p8 = scmp.lt.s32.totalorder (!%p219_p3), %s303_s7, 11 }
   0xe   : > { %vm339_vm0 = vcmask 64512   ;;  %vm341_vm1 = vcmask 58368   ;;  %v778_v0 = vmov 0.0   ;;  %s909_s13 = smov (!%p278_p5, %s764_s13), 1  ;;  %s911_s19 = smov (!%p291_p6, %s287_s19), 11  ;;  %vm333_vm2 = vcmask 7168  }
   0xf   : > { %340 = vst.msk [vmem:[#allocation4] sm:$0xff] %vm339_vm0, %v778_v0  ;;  %s839_s20 = smul.u32 24, %s909_s13  ;;  %s658_s21 = sshll.u32 %s911_s19, 1  ;;  %v779_v12 = vmov -inf   ;;  %vm380_vm3 = vcmask 80896   ;;  %vm384_vm4 = vcmask 74752  }
  0x10   : > { %342 = vst.msk [vmem:[#allocation4 + $0x8] sm:$0x3] %vm341_vm1, %v778_v0  ;;  %s281_s27 = scalar_select %p280_p7, %s760_s12, 11  ;;  %vm335_vm5 = vcmask 1024   ;;  %v780_v17 = vmov 0   ;;  %vm453_vm6 = vcmask 1044480  }
  0x11   : > { %s298_s22 = sadd.s32 %s839_s20, %s658_s21  ;;  %334 = vst.msk [vmem:[#allocation2] sm:$0xff] %vm333_vm2, %v779_v12  ;;  %723 = vset.pattern.permute.xlu1 %v780_v17  ;;  %724 = vset.pattern.permute.xlu0 %v780_v17  ;;  %s913_s7 = smov (!%p307_p8, %s303_s7), 11  ;;  %vm501_vm7 = vcmask 60416   ;;  %vm503_vm8 = vcmask 57344  }
  0x12   : > { %s659_s23 = sshll.u32 %s298_s22, 2  ;;  %s656_s28 = sshll.u32 %s281_s27, 1  ;;  %337 = vst.msk [vmem:[#allocation3] sm:$0xff] %vm333_vm2, %v778_v0  ;;  %725 = vset.pattern.permute.xlu2 %v780_v17 }
  0x13   : > { %s300_s26 = scalar_lea.vmem %s895_s1, %s659_s23  ;;  %s284_s29 = sadd.s32 %s839_s20, %s656_s28  ;;  %336 = vst.msk [vmem:[#allocation2 + $0x8] sm:$0x3] %vm335_vm5, %v779_v12 }
  0x14   : > { %v667_v1 = vld [vmem:[%s300_s26] sm:$0xf]  ;;  %v677_v2 = vld [vmem:[%s300_s26] sm:$0x10]  ;;  %s657_s30 = sshll.u32 %s284_s29, 2  ;;  %s660_s8 = sshll.u32 %s913_s7, 1 }
  0x15   : > { %v668_v3 = vor.u32 %v677_v2, %v667_v1  ;;  %s286_s6 = scalar_lea.vmem %s894_s0, %s657_s30  ;;  %338 = vst.msk [vmem:[#allocation3 + $0x8] sm:$0x3] %vm335_vm5, %v778_v0  ;;  %s314_s9 = sadd.s32 %s839_s20, %s660_s8 }
  0x16   : > { %v343_v5 = vld [vmem:[%s286_s6] sm:$0xf]  ;;  %v344_v6 = vld [vmem:[%s286_s6 + $0x4] sm:$0x1]  ;;  %s661_s10 = sshll.u32 %s314_s9, 2  ;;  %s915_s12 = smov (!%p321_p9, %s760_s12), 3 }
  0x17   : > { %v362_v4 = vsel %vm339_vm0, %v668_v3, 0  ;;  %v345_v7 = vunpack.c.l.bf16 %v343_v5  ;;  %v346_v8 = vunpack.c.l.bf16 %v344_v6  ;;  %s316_s21 = scalar_lea.vmem %s896_s2, %s661_s10  ;;  %v428_v54 = vld [vmem:[#allocation4] sm:$0xff]  ;;  %v429_v61 = vld [vmem:[#allocation4 + $0x8] sm:$0x3]  ;;  %s662_s20 = sshll.u32 %s915_s12, 1 }
  0x18   : > { %371 = vmatpush.bf16.xpose.msra.mxu0 %v362_v4  ;;  %v378_v18 = vld [vmem:[#allocation2] sm:$0xff]  ;;  %s663_s22 = sshll.u32 %s909_s13, 3 }
  0x19   : > { %v347_v9 = vmul.f32 0.35355338, %v345_v7  ;;  %v348_v10 = vmul.f32 0.35355338, %v346_v8  ;;  %v672_v30 = vld [vmem:[%s316_s21] sm:$0xf]  ;;  %s325_s23 = sadd.s32 %s663_s22, %s662_s20 }
  0x1a   : > { %v379_v23 = vld [vmem:[#allocation2 + $0x8] sm:$0x3]  ;;  %v678_v31 = vld [vmem:[%s316_s21] sm:$0x10]  ;;  %v412_v45 = vld [vmem:[#allocation3] sm:$0xff]  ;;  %s664_s24 = sshll.u32 %s325_s23, 2 }
  0x1b   : > { %v349_v11 = vpack.c.bf16 %v348_v10, %v347_v9  ;;  %v673_v32 = vor.u32 %v678_v31, %v672_v30  ;;  %s327_s27 = scalar_lea.vmem %s897_s3, %s664_s24 }
  0x1c   : > { %v413_v49 = vld [vmem:[#allocation3 + $0x8] sm:$0x3] }
  0x1d   : > { %v455_v33 = vsel %vm453_vm6, %v673_v32, 0 }
  0x1e   : > { %464 = vmatpush.bf16.msra.mxu1 %v455_v33 }
  0x1f   : > { %669 = vmatmul.msk.bf16.vlgmr.msra.gmra.mxu0 %vm339_vm0, %v349_v11 }
  0x9c   : > { %v373_v13 = vpop.f32.mrf.mxu0 }
  0x9d   : > { %v381_v14 = vsel %vm380_vm3, %v373_v13, -inf }
  0x9e   : > { %382 = vmax.xlane.f32.xlu0 %v381_v14 }
  0xa4   : > { %v375_v15 = vpop.f32.mrf.mxu0 }
  0xa5   : > { %v385_v16 = vsel %vm384_vm4, %v375_v15, -inf }
  0xa6   : > { %386 = vmax.xlane.f32.xlu0 %v385_v16 }
 0x111   : > { %v383_v19 = vpop.xlane.xlu0 %382 }
 0x112   : > { %v388_v20 = vmax.f32 %v378_v18, %v383_v19 }
 0x114   : > { %v390_v21 = vsub.f32 %v378_v18, %v388_v20  ;;  %476 = vst.msk [vmem:[#allocation2] sm:$0xff] %vm333_vm2, %v388_v20  ;;  %398 = vperm.xlu1 %723, %v388_v20  }
 0x116   : > { %v392_v22 = vmul.f32 1.442695, %v390_v21 }
 0x118   : > { %726 = vpow2.f32 %v392_v22 }
 0x119   : > { %v387_v24 = vpop.xlane.xlu0 %386 }
 0x11a   : > { %v389_v25 = vmax.f32 %v379_v23, %v387_v24 }
 0x11c   : > { %v391_v26 = vsub.f32 %v379_v23, %v389_v25  ;;  %477 = vst.msk [vmem:[#allocation2 + $0x8] sm:$0x3] %vm335_vm5, %v389_v25  ;;  %403 = vperm.xlu1 %723, %v389_v25  }
 0x11e   : > { %v727_v27 = vpop.eup %726  ;;  %v394_v28 = vmul.f32 1.442695, %v391_v26 }
 0x11f   : > { %432 = vperm.xlu0 %724, %v727_v27   ;;  %v414_v46 = vmul.f32 %v727_v27, %v412_v45 }
 0x120   : > { %728 = vpow2.f32 %v394_v28 }
 0x126   : > { %v729_v29 = vpop.eup %728 }
 0x127   : > { %437 = vperm.xlu1 %723, %v729_v29   ;;  %v415_v50 = vmul.f32 %v729_v29, %v413_v49 }
 0x186   : > { %v399_v34 = vpop.permute.xlu1 %398 }
 0x187   : > { %v406_v35 = vsub.f32 %v373_v13, %v399_v34 }
 0x189   : > { %v408_v36 = vmul.f32 1.442695, %v406_v35 }
 0x18b   : > { %730 = vpow2.f32 %v408_v36 }
 0x18e   : > { %v404_v37 = vpop.permute.xlu1 %403 }
 0x18f   : > { %v407_v38 = vsub.f32 %v375_v15, %v404_v37 }
 0x191   : > { %v731_v39 = vpop.eup %730  ;;  %v410_v40 = vmul.f32 1.442695, %v407_v38  ;;  %v433_v55 = vpop.permute.xlu0 %432 }
 0x192   : > { %v416_v41 = vsel %vm380_vm3, %v731_v39, 0.0  ;;  %v440_v57 = vmul.f32 %v433_v55, %v428_v54 }
 0x193   : > { %732 = vpow2.f32 %v410_v40  ;;  %417 = vadd.xlane.f32.xlu2 %v416_v41 }
 0x199   : > { %v733_v42 = vpop.eup %732  ;;  %v438_v62 = vpop.permute.xlu1 %437 }
 0x19a   : > { %v419_v43 = vsel %vm384_vm4, %v733_v42, 0.0  ;;  %v442_v44 = vpack.c.bf16 %v733_v42, %v731_v39  ;;  %v441_v0 = vmul.f32 %v438_v62, %v429_v61 }
 0x19b   : > { %420 = vadd.xlane.f32.xlu2 %v419_v43 }
 0x19c   : > { %674 = vmatmul.msk.bf16.vlgmr.msra.gmra.mxu1 %vm380_vm3, %v442_v44 }
 0x206   : > { %v418_v47 = vpop.xlane.xlu2 %417 }
 0x207   : > { %v422_v48 = vadd.f32 %v418_v47, %v414_v46 }
 0x209   : > { %425 = vst.msk [vmem:[#allocation3] sm:$0xff] %vm333_vm2, %v422_v48 }
 0x20e   : > { %v421_v51 = vpop.xlane.xlu2 %420 }
 0x20f   : > { %v423_v52 = vadd.f32 %v421_v51, %v415_v50 }
 0x210   : > { %v483_v53 = vld [vmem:[#allocation3] sm:$0xff] }
 0x211   : > { %427 = vst.msk [vmem:[#allocation3 + $0x8] sm:$0x3] %vm335_vm5, %v423_v52  ;;  %734 = vrcp.f32 %v483_v53 }
 0x217   : > { %v735_v56 = vpop.eup %734 }
 0x218   : > { %489 = vperm.xlu2 %725, %v735_v56   ;;  %v484_v58 = vld [vmem:[#allocation3 + $0x8] sm:$0x3] }
 0x219   : > { %v466_v59 = vpop.f32.mrf.mxu1  ;;  %736 = vrcp.f32 %v484_v58 }
 0x21a   : > { %v471_v60 = vadd.f32 %v466_v59, %v440_v57 }
 0x21c   : > { %473 = vst.msk [vmem:[#allocation4] sm:$0xff] %vm339_vm0, %v471_v60 }
 0x21f   : > { %v737_v63 = vpop.eup %736 }
 0x220   : > { %494 = vperm.xlu1 %723, %v737_v63  }
 0x221   : > { %v468_v1 = vpop.f32.mrf.mxu1 }
 0x222   : > { %v472_v2 = vadd.f32 %v468_v1, %v441_v0 }
 0x223   : > { %v481_v4 = vld [vmem:[#allocation4] sm:$0xff] }
 0x224   : > { %475 = vst.msk [vmem:[#allocation4 + $0x8] sm:$0x3] %vm341_vm1, %v472_v2 }
 0x22b   : > { %v482_v7 = vld [vmem:[#allocation4 + $0x8] sm:$0x3] }
 0x272   : > { %v490_v3 = vpop.permute.xlu2 %489 }
 0x273   : > { %v497_v5 = vmul.f32 %v490_v3, %v481_v4 }
 0x275   : > { %v499_v6 = vpack.c.bf16 %v497_v5, %v497_v5 }
 0x277   : > { %502 = vst.msk [vmem:[%s327_s27] sm:$0xf] %vm501_vm7, %v499_v6 }
 0x292   : > { %v495_v8 = vpop.permute.xlu1 %494 }
 0x293   : > { %v498_v9 = vmul.f32 %v495_v8, %v482_v7 }
 0x295   : > { %v500_v10 = vpack.c.bf16 %v498_v9, %v498_v9 }
 0x297   : > { %504 = vst.msk [vmem:[%s327_s27 + $0x4] sm:$0x1] %vm503_vm8, %v500_v10 }
 0x298 PF: > { %s13_s16 = sadd.s32 1, %s776_s16   ;;  %s898_s12 = smov %s768_s14 }
 0x299   : > { %p10_p10 = scmp.ge.s32.totalorder %s13_s16, 10   ;;  %s899_s13 = smov %s772_s15 }
 0x29a   : > { %s900_s14 = smov %s903_s17  ;;  %s901_s15 = smov %s907_s18 }
 0x29b   :  { %12 = sbr.rel (!%p10_p10) target bundleno = 3 (0x3), region = 76 }

// kernel: vit_wrapper_forward.15
= control target key start
LH: loop header
LB: loop body
LE: loop exit
PB: predicated region body
PF: predicated region fallthrough
CT: control target
= control target key end

     0   :  { %vm52_vm0 = vcmask 261120   ;;  %vm92_vm1 = vcmask 257024   ;;  %s189_s1 = inlined_call_operand.vmem [shape: bf16[32,32], index: 1, kind: input, shape index: {}]   ;;  %s190_s0 = inlined_call_operand.vmem [shape: bf16[20,32], index: 0, kind: input, shape index: {}]   ;;  %s191_s2 = inlined_call_operand.vmem [shape: f32[1,32], index: 2, kind: input, shape index: {}]   ;;  %s192_s3 = inlined_call_operand.vmem [shape: f32[1,32], index: 3, kind: input, shape index: {}]   ;;  %s193_s4 = inlined_call_operand.vmem [shape: f32[20,32], index: 4, kind: input, shape index: {}, may-alias: {4,5}]   ;;  %s194_s5 = inlined_call_operand.vmem [shape: f32[20,32], index: 5, kind: output, shape index: {}, may-alias: {4,5}]  }
   0x1   :  { %v114_v0 = vld [vmem:[%s189_s1 + $0x8] sm:$0xff]  ;;  %v113_v2 = vld [vmem:[%s189_s1] sm:$0xff]  ;;  %v79_v13 = vld [vmem:[%s193_s4 + $0x10] sm:$0xf] }
   0x2   :  { %v23_v1 = vld [vmem:[%s190_s0 + $0x8] sm:$0x3]  ;;  %65 = vmatpush.bf16.msra.mxu0 %v114_v0  ;;  %115 = vmatpush.bf16.msra.mxu1 %v114_v0  ;;  %v112_v4 = vld [vmem:[%s190_s0] sm:$0xff] }
   0x3   :  { %v37_v3 = vunpack.c.l.b16 %v23_v1  ;;  %v117_v6 = vld [vmem:[%s191_s2] ss:$0 sm:$0xff] }
   0x4   :  { %v118_v7 = vld [vmem:[%s192_s3] ss:$0 sm:$0xff] }
   0x5   :  { %v39_v5 = vpack.c.b16 %v37_v3, %v37_v3  ;;  %v77_v12 = vld [vmem:[%s193_s4] sm:$0xff] }
   0x6   :  { %66 = vmatpush.bf16.msra.mxu0 %v113_v2  ;;  %116 = vmatpush.bf16.msra.mxu1 %v113_v2 }
   0x9   :  { %110 = vmatmul.msk.bf16.vlgmr.msra.gmra.mxu0 %vm52_vm0, %v112_v4  ;;  %111 = vmatmul.msk.bf16.vlgmr.msra.gmra.mxu1 %vm52_vm0, %v39_v5 }
  0x86   :  { %v68_v8 = vpop.f32.mrf.mxu0  ;;  %v73_v9 = vpop.f32.mrf.mxu1 }
  0x87   :  { %v69_v10 = vadd.f32 %v117_v6, %v68_v8  ;;  %v74_v11 = vadd.f32 %v117_v6, %v73_v9 }
  0x89   :  { %v84_v14 = vmul.f32 %v118_v7, %v69_v10  ;;  %v86_v15 = vmul.f32 %v118_v7, %v74_v11 }
  0x8b   :  { %v87_v16 = vadd.f32 %v84_v14, %v77_v12  ;;  %v89_v17 = vadd.f32 %v86_v15, %v79_v13 }
  0x8d   :  { %90 = vst.msk [vmem:[%s194_s5] sm:$0xff] %vm52_vm0, %v87_v16 }
  0x8e   :  { %93 = vst.msk [vmem:[%s194_s5 + $0x10] sm:$0xf] %vm92_vm1, %v89_v17  ;;  %v70_v18 = vpop.f32.mrf.mxu0  ;;  %v75_v19 = vpop.f32.mrf.mxu1 }
  0x8f   :  { %v71_v20 = vadd.f32 %v117_v6, %v70_v18 }
  0x91   :  { %v85_v22 = vmul.f32 %v118_v7, %v71_v20 }
  0x95   :  { %v78_v21 = vld [vmem:[%s193_s4 + $0x8] sm:$0xff] }
  0x96   :  { %v88_v23 = vadd.f32 %v85_v22, %v78_v21 }
  0x98   :  { %91 = vst.msk [vmem:[%s194_s5 + $0x8] sm:$0xff] %vm52_vm0, %v88_v23 }

// kernel: vit_wrapper_forward.16
= control target key start
LH: loop header
LB: loop body
LE: loop exit
PB: predicated region body
PF: predicated region fallthrough
CT: control target
= control target key end

     0   :  { %vm24_vm0 = vcmask 261120   ;;  %vm31_vm1 = vcmask 257024   ;;  %v341_v6 = vmov 32.0   ;;  %s464_s0 = inlined_call_operand.vmem [shape: f32[20,32], index: 0, kind: input, shape index: {}]   ;;  %s465_s1 = inlined_call_operand.vmem [shape: f32[1,32], index: 1, kind: input, shape index: {}]   ;;  %s466_s2 = inlined_call_operand.vmem [shape: f32[1,32], index: 2, kind: input, shape index: {}]   ;;  %s467_s4 = inlined_call_operand.vmem [shape: f32[1,128], index: 4, kind: input, shape index: {}]   ;;  %s468_s3 = inlined_call_operand.vmem [shape: bf16[32,128], index: 3, kind: input, shape index: {}]   ;;  %s469_s5 = inlined_call_operand.vmem [shape: bf16[20,128], index: 5, kind: output, shape index: {}]  }
   0x1   :  { %v21_v0 = vld [vmem:[%s464_s0] sm:$0xff]  ;;  %v23_v1 = vld [vmem:[%s464_s0 + $0x10] sm:$0xf]  ;;  %v22_v4 = vld [vmem:[%s464_s0 + $0x8] sm:$0xff]  ;;  %321 = vrcp.f32 %v341_v6 }
   0x2   :  { %v25_v2 = vsel %vm24_vm0, %v21_v0, 0.0  ;;  %v32_v3 = vsel %vm31_vm1, %v23_v1, 0.0  ;;  %v28_v5 = vsel %vm24_vm0, %v22_v4, 0.0  ;;  %v309_v28 = vld [vmem:[%s468_s3 + $0x8] sm:$0xff]  ;;  %v308_v31 = vld [vmem:[%s468_s3] sm:$0xff] }
   0x3   :  { %26 = vadd.xlane.f32.xlu0 %v25_v2  ;;  %33 = vadd.xlane.f32.xlu1 %v32_v3  ;;  %v318_v53 = vld [vmem:[%s465_s1] ss:$0 sm:$0xff] }
   0x4   :  { %147 = vmatpush.bf16.msra.mxu0 %v309_v28  ;;  %315 = vmatpush.bf16.msra.mxu1 %v309_v28  ;;  %v319_v60 = vld [vmem:[%s466_s2] ss:$0 sm:$0xff] }
   0x7   :  { %v322_v7 = vpop.eup %321 }
   0x8   :  { %v36_v8 = vmul.f32 32.0, %v322_v7  ;;  %vm40_vm2 = vweird.f32 %v322_v7  ;;  %148 = vmatpush.bf16.msra.mxu0 %v308_v31  ;;  %316 = vmatpush.bf16.msra.mxu1 %v308_v31 }
   0xa   :  { %v37_v9 = vsub.f32 1.0, %v36_v8 }
   0xb   :  { %29 = vadd.xlane.f32.xlu0 %v28_v5 }
   0xc   :  { %v38_v10 = vmul.f32 %v322_v7, %v37_v9  ;;  %v320_v9 = vld [vmem:[%s467_s4] ss:$0 sm:$0xff] }
   0xe   :  { %v39_v11 = vadd.f32 %v322_v7, %v38_v10 }
  0x10   :  { %v41_v12 = vsel %vm40_vm2, %v322_v7, %v39_v11 }
  0x76   :  { %v27_v13 = vpop.xlane.xlu0 %26  ;;  %v34_v17 = vpop.xlane.xlu1 %33 }
  0x77   :  { %v42_v14 = vmul.f32 %v41_v12, %v27_v13  ;;  %v44_v21 = vmul.f32 %v41_v12, %v34_v17 }
  0x79   :  { %v45_v15 = vsub.f32 %v21_v0, %v42_v14  ;;  %v385_v23 = vsub.f32 %v23_v1, %v44_v21 }
  0x7b   :  { %v48_v16 = vmul.f32 %v45_v15, %v45_v15  ;;  %v50_v26 = vmul.f32 %v385_v23, %v385_v23 }
  0x7d   :  { %v51_v18 = vsel %vm24_vm0, %v48_v16, 0.0  ;;  %v57_v27 = vsel %vm31_vm1, %v50_v26, 0.0 }
  0x7e   :  { %52 = vadd.xlane.f32.xlu1 %v51_v18  ;;  %v30_v19 = vpop.xlane.xlu0 %29 }
  0x7f   :  { %v43_v20 = vmul.f32 %v41_v12, %v30_v19 }
  0x81   :  { %v46_v22 = vsub.f32 %v22_v4, %v43_v20 }
  0x83   :  { %v49_v24 = vmul.f32 %v46_v22, %v46_v22 }
  0x85   :  { %v54_v25 = vsel %vm24_vm0, %v49_v24, 0.0 }
  0x86   :  { %55 = vadd.xlane.f32.xlu2 %v54_v25 }
  0x8e   :  { %58 = vadd.xlane.f32.xlu2 %v57_v27 }
  0xf1   :  { %v53_v29 = vpop.xlane.xlu1 %52 }
  0xf2   :  { %v60_v30 = vmul.f32 %v53_v29, %v41_v12 }
  0xf4   :  { %v63_v32 = vadd.f32 1e-06, %v60_v30 }
  0xf6   :  { %323 = vrsqrt.f32 %v63_v32  ;;  %vm72_vm4 = vweird.f32 %v63_v32 }
  0xf9   :  { %v56_v33 = vpop.xlane.xlu2 %55 }
  0xfa   :  { %v61_v34 = vmul.f32 %v56_v33, %v41_v12 }
  0xfc   :  { %v324_v35 = vpop.eup %323  ;;  %v64_v36 = vadd.f32 1e-06, %v61_v34 }
  0xfd   :  { %v67_v37 = vmul.f32 %v324_v35, %v63_v32  ;;  %vm73_vm3 = vweird.f32 %v324_v35 }
  0xfe   :  { %325 = vrsqrt.f32 %v64_v36  ;;  %vm74_vm5 = vmor %vm72_vm4, %vm73_vm3  ;;  %vm82_vm7 = vweird.f32 %v64_v36 }
  0xff   :  { %v68_v38 = vmul.f32 %v324_v35, %v67_v37 }
 0x101   :  { %v69_v39 = vmul.f32 0.5, %v68_v38  ;;  %v59_v40 = vpop.xlane.xlu2 %58 }
 0x102   :  { %v62_v41 = vmul.f32 %v59_v40, %v41_v12 }
 0x103   :  { %v70_v42 = vsub.f32 1.5, %v69_v39 }
 0x104   :  { %v326_v43 = vpop.eup %325  ;;  %v65_v44 = vadd.f32 1e-06, %v62_v41 }
 0x105   :  { %v71_v45 = vmul.f32 %v324_v35, %v70_v42  ;;  %v77_v46 = vmul.f32 %v326_v43, %v64_v36  ;;  %vm83_vm6 = vweird.f32 %v326_v43 }
 0x106   :  { %327 = vrsqrt.f32 %v65_v44  ;;  %vm84_vm8 = vmor %vm82_vm7, %vm83_vm6  ;;  %vm92_vm10 = vweird.f32 %v65_v44 }
 0x107   :  { %v78_v47 = vmul.f32 %v326_v43, %v77_v46  ;;  %v75_v48 = vsel %vm74_vm5, %v324_v35, %v71_v45 }
 0x108   :  { %v96_v52 = vmul.f32 %v75_v48, %v45_v15 }
 0x109   :  { %v79_v49 = vmul.f32 0.5, %v78_v47 }
 0x10a   :  { %v103_v59 = vmul.f32 %v318_v53, %v96_v52 }
 0x10b   :  { %v80_v50 = vsub.f32 1.5, %v79_v49 }
 0x10c   :  { %v328_v51 = vpop.eup %327  ;;  %v110_v0 = vadd.f32 %v319_v60, %v103_v59 }
 0x10d   :  { %v81_v54 = vmul.f32 %v326_v43, %v80_v50  ;;  %v87_v55 = vmul.f32 %v328_v51, %v65_v44  ;;  %vm93_vm9 = vweird.f32 %v328_v51 }
 0x10e   :  { %vm94_vm11 = vmor %vm92_vm10, %vm93_vm9 }
 0x10f   :  { %v85_v56 = vsel %vm84_vm8, %v326_v43, %v81_v54  ;;  %v88_v57 = vmul.f32 %v328_v51, %v87_v55 }
 0x110   :  { %v97_v58 = vmul.f32 %v85_v56, %v46_v22 }
 0x111   :  { %v89_v61 = vmul.f32 0.5, %v88_v57 }
 0x112   :  { %v104_v62 = vmul.f32 %v318_v53, %v97_v58 }
 0x113   :  { %v90_v63 = vsub.f32 1.5, %v89_v61 }
 0x114   :  { %v111_v1 = vadd.f32 %v319_v60, %v104_v62 }
 0x115   :  { %v91_v2 = vmul.f32 %v328_v51, %v90_v63 }
 0x116   :  { %v113_v3 = vpack.c.bf16 %v111_v1, %v110_v0 }
 0x117   :  { %v95_v4 = vsel %vm94_vm11, %v328_v51, %v91_v2 }
 0x118   :  { %300 = vmatmul.msk.bf16.vlgmr.msra.gmra.mxu0 %vm24_vm0, %v113_v3  ;;  %v98_v5 = vmul.f32 %v95_v4, %v385_v23 }
 0x11a   :  { %v105_v6 = vmul.f32 %v318_v53, %v98_v5 }
 0x11c   :  { %v112_v7 = vadd.f32 %v319_v60, %v105_v6 }
 0x11e   :  { %v114_v8 = vpack.c.bf16 %v112_v7, %v112_v7 }
 0x120   :  { %301 = vmatmul.msk.bf16.vlgmr.msra.gmra.mxu1 %vm24_vm0, %v114_v8 }
 0x195   :  { %v150_v10 = vpop.f32.mrf.mxu0 }
 0x196   :  { %v409_v11 = vadd.f32 %v320_v9, %v150_v10 }
 0x198   :  { %v412_v12 = vmul.f32 0.70710677, %v409_v11 }
 0x19a   :  { %vm162_vm12 = vcmp.ge.f32.partialorder %v412_v12, 0.0  ;;  %v165_v13 = vsub.f32 0.0, %v412_v12 }
 0x19c   :  { %v168_v14 = vsel %vm162_vm12, %v412_v12, %v165_v13 }
 0x19d   :  { %v171_v15 = vmul.f32 0.3275911, %v168_v14  ;;  %v152_v16 = vpop.f32.mrf.mxu0  ;;  %v155_v17 = vpop.f32.mrf.mxu1  ;;  %v249_v41 = vsub.f32 0.0, %v168_v14 }
 0x19e   :  { %v419_v18 = vadd.f32 %v320_v9, %v152_v16  ;;  %v421_v19 = vadd.f32 %v320_v9, %v155_v17 }
 0x19f   :  { %v174_v20 = vadd.f32 1.0, %v171_v15  ;;  %v252_v49 = vmul.f32 %v249_v41, %v168_v14 }
 0x1a0   :  { %v424_v21 = vmul.f32 0.70710677, %v419_v18  ;;  %v427_v22 = vmul.f32 0.70710677, %v421_v19 }
 0x1a1   :  { %329 = vrcp.f32 %v174_v20  ;;  %v188_v35 = vand.u32 2147483648, %v174_v20  ;;  %v186_v37 = vand.u32 2147483647, %v174_v20  ;;  %vm182_vm0 = vweird.f32 %v174_v20 }
 0x1a2   :  { %vm163_vm13 = vcmp.ge.f32.partialorder %v424_v21, 0.0  ;;  %v166_v23 = vsub.f32 0.0, %v424_v21  ;;  %vm164_vm14 = vcmp.ge.f32.partialorder %v427_v22, 0.0  ;;  %v167_v24 = vsub.f32 0.0, %v427_v22 }
 0x1a3   :  { %v189_v40 = vor.u32 1.1754944e-38, %v188_v35  ;;  %vm187_vm2 = vcmp.eq.f32.partialorder %v186_v37, 8.507059e+37  ;;  %v255_v60 = vmul.f32 1.442695, %v252_v49 }
 0x1a4   :  { %v436_v25 = vsel %vm163_vm13, %v424_v21, %v166_v23  ;;  %v442_v27 = vsel %vm164_vm14, %v427_v22, %v167_v24 }
 0x1a5   :  { %v172_v26 = vmul.f32 0.3275911, %v436_v25  ;;  %v157_v28 = vpop.f32.mrf.mxu1  ;;  %v173_v29 = vmul.f32 0.3275911, %v442_v27  ;;  %v250_v3 = vsub.f32 0.0, %v436_v25  ;;  %v251_v8 = vsub.f32 0.0, %v442_v27 }
 0x1a7   :  { %v330_v30 = vpop.eup %329  ;;  %v175_v31 = vadd.f32 1.0, %v172_v26  ;;  %v176_v33 = vadd.f32 1.0, %v173_v29  ;;  %v253_v14 = vmul.f32 %v250_v3, %v436_v25 }
 0x1a8   :  { %v178_v32 = vmul.f32 %v330_v30, %v174_v20  ;;  %vm183_vm15 = vweird.f32 %v330_v30  ;;  %v254_v20 = vmul.f32 %v251_v8, %v442_v27 }
 0x1a9   :  { %331 = vrcp.f32 %v175_v31  ;;  %vm184_vm1 = vmor %vm182_vm0, %vm183_vm15  ;;  %v201_v50 = vand.u32 2147483647, %v175_v31  ;;  %v203_v51 = vand.u32 2147483648, %v175_v31  ;;  %v218_v55 = vand.u32 2147483648, %v176_v33 }
 0x1aa   :  { %v179_v34 = vsub.f32 1.0, %v178_v32  ;;  %333 = vrcp.f32 %v176_v33  ;;  %v216_v57 = vand.u32 2147483647, %v176_v33  ;;  %vm197_vm5 = vweird.f32 %v175_v31 }
 0x1ab   :  { %v204_v61 = vor.u32 1.1754944e-38, %v203_v51  ;;  %vm212_vm7 = vweird.f32 %v176_v33  ;;  %vm202_vm8 = vcmp.eq.f32.partialorder %v201_v50, 8.507059e+37  ;;  %v219_v1 = vor.u32 1.1754944e-38, %v218_v55 }
 0x1ac   :  { %v180_v36 = vmul.f32 %v330_v30, %v179_v34  ;;  %vm217_vm10 = vcmp.eq.f32.partialorder %v216_v57, 8.507059e+37  ;;  %335 = vpow2.f32 %v255_v60  ;;  %v257_v28 = vmul.f32 1.442695, %v253_v14 }
 0x1ad   :  { %v259_v32 = vmul.f32 1.442695, %v254_v20  ;;  %v273_v55 = vmul.f32 0.5, %v409_v11 }
 0x1ae   :  { %v181_v38 = vadd.f32 %v330_v30, %v180_v36  ;;  %337 = vpow2.f32 %v257_v28 }
 0x1af   :  { %v332_v39 = vpop.eup %331  ;;  %339 = vpow2.f32 %v259_v32 }
 0x1b0   :  { %v334_v42 = vpop.eup %333  ;;  %v185_v43 = vsel %vm184_vm1, %v330_v30, %v181_v38  ;;  %v193_v44 = vmul.f32 %v332_v39, %v175_v31  ;;  %vm198_vm3 = vweird.f32 %v332_v39 }
 0x1b1   :  { %v190_v45 = vsel %vm187_vm2, %v189_v40, %v185_v43  ;;  %v208_v46 = vmul.f32 %v334_v42, %v176_v33  ;;  %vm213_vm4 = vweird.f32 %v334_v42  ;;  %vm199_vm6 = vmor %vm197_vm5, %vm198_vm3 }
 0x1b2   :  { %v222_v47 = vmul.f32 1.0614054, %v190_v45  ;;  %v194_v48 = vsub.f32 1.0, %v193_v44  ;;  %vm214_vm9 = vmor %vm212_vm7, %vm213_vm4  ;;  %v336_v33 = vpop.eup %335 }
 0x1b3   :  { %v209_v52 = vsub.f32 1.0, %v208_v46 }
 0x1b4   :  { %v302_v53 = vadd.f32 -1.4531521, %v222_v47  ;;  %v195_v54 = vmul.f32 %v332_v39, %v194_v48  ;;  %v338_v43 = vpop.eup %337 }
 0x1b5   :  { %v210_v56 = vmul.f32 %v334_v42, %v209_v52  ;;  %v340_v46 = vpop.eup %339 }
 0x1b6   :  { %v228_v58 = vmul.f32 %v302_v53, %v190_v45  ;;  %v196_v59 = vadd.f32 %v332_v39, %v195_v54 }
 0x1b7   :  { %v211_v62 = vadd.f32 %v334_v42, %v210_v56  ;;  %v274_v56 = vmul.f32 0.5, %v419_v18 }
 0x1b8   :  { %v231_v63 = vadd.f32 1.4214138, %v228_v58  ;;  %v200_v0 = vsel %vm199_vm6, %v332_v39, %v196_v59  ;;  %v275_v59 = vmul.f32 0.5, %v421_v19 }
 0x1b9   :  { %v205_v2 = vsel %vm202_vm8, %v204_v61, %v200_v0  ;;  %v215_v4 = vsel %vm214_vm9, %v334_v42, %v211_v62 }
 0x1ba   :  { %v234_v5 = vmul.f32 %v231_v63, %v190_v45  ;;  %v223_v6 = vmul.f32 1.0614054, %v205_v2  ;;  %v220_v7 = vsel %vm217_vm10, %v219_v1, %v215_v4 }
 0x1bb   :  { %v224_v9 = vmul.f32 1.0614054, %v220_v7 }
 0x1bc   :  { %v305_v10 = vadd.f32 -0.28449672, %v234_v5  ;;  %v303_v13 = vadd.f32 -1.4531521, %v223_v6 }
 0x1bd   :  { %v304_v15 = vadd.f32 -1.4531521, %v224_v9 }
 0x1be   :  { %v240_v16 = vmul.f32 %v305_v10, %v190_v45  ;;  %v229_v17 = vmul.f32 %v303_v13, %v205_v2 }
 0x1bf   :  { %v230_v23 = vmul.f32 %v304_v15, %v220_v7 }
 0x1c0   :  { %v243_v24 = vadd.f32 0.2548296, %v240_v16  ;;  %v232_v26 = vadd.f32 1.4214138, %v229_v17 }
 0x1c1   :  { %v233_v29 = vadd.f32 1.4214138, %v230_v23 }
 0x1c2   :  { %v246_v30 = vmul.f32 %v243_v24, %v190_v45  ;;  %v235_v31 = vmul.f32 %v232_v26, %v205_v2 }
 0x1c3   :  { %v236_v34 = vmul.f32 %v233_v29, %v220_v7 }
 0x1c4   :  { %v261_v35 = vmul.f32 %v336_v33, %v246_v30  ;;  %v306_v36 = vadd.f32 -0.28449672, %v235_v31 }
 0x1c5   :  { %v307_v37 = vadd.f32 -0.28449672, %v236_v34 }
 0x1c6   :  { %v264_v25 = vsub.f32 1.0, %v261_v35  ;;  %v241_v38 = vmul.f32 %v306_v36, %v205_v2 }
 0x1c7   :  { %v242_v39 = vmul.f32 %v307_v37, %v220_v7 }
 0x1c8   :  { %v244_v40 = vadd.f32 0.2548296, %v241_v38  ;;  %v267_v41 = vsub.f32 0.0, %v264_v25 }
 0x1c9   :  { %v245_v27 = vadd.f32 0.2548296, %v242_v39 }
 0x1ca   :  { %v247_v42 = vmul.f32 %v244_v40, %v205_v2  ;;  %v270_v48 = vsel %vm162_vm12, %v264_v25, %v267_v41 }
 0x1cb   :  { %v248_v44 = vmul.f32 %v245_v27, %v220_v7  ;;  %v276_v52 = vadd.f32 1.0, %v270_v48 }
 0x1cc   :  { %v262_v45 = vmul.f32 %v338_v43, %v247_v42 }
 0x1cd   :  { %v263_v47 = vmul.f32 %v340_v46, %v248_v44  ;;  %v279_v60 = vmul.f32 %v276_v52, %v273_v55 }
 0x1ce   :  { %v265_v49 = vsub.f32 1.0, %v262_v45 }
 0x1cf   :  { %v266_v50 = vsub.f32 1.0, %v263_v47 }
 0x1d0   :  { %v268_v51 = vsub.f32 0.0, %v265_v49 }
 0x1d1   :  { %v269_v53 = vsub.f32 0.0, %v266_v50 }
 0x1d2   :  { %v271_v54 = vsel %vm163_vm13, %v265_v49, %v268_v51 }
 0x1d3   :  { %v277_v57 = vadd.f32 1.0, %v271_v54  ;;  %v272_v58 = vsel %vm164_vm14, %v266_v50, %v269_v53 }
 0x1d4   :  { %v278_v12 = vadd.f32 1.0, %v272_v58 }
 0x1d5   :  { %v280_v61 = vmul.f32 %v277_v57, %v274_v56 }
 0x1d6   :  { %v281_v62 = vmul.f32 %v278_v12, %v275_v59 }
 0x1d7   :  { %v313_v63 = vpack.c.bf16 %v280_v61, %v279_v60 }
 0x1d8   :  { %v284_v0 = vpack.c.bf16 %v281_v62, %v281_v62 }
 0x1d9   :  { %314 = vst [vmem:[%s469_s5] sm:$0xff] %v313_v63  }
 0x1da   :  { %287 = vst [vmem:[%s469_s5 + $0x8] sm:$0x3] %v284_v0 }

// kernel: vit_wrapper_forward.17
= control target key start
LH: loop header
LB: loop body
LE: loop exit
PB: predicated region body
PF: predicated region fallthrough
CT: control target
= control target key end

     0   :  { %vm132_vm0 = vcmask 261120   ;;  %vm135_vm1 = vcmask 257024   ;;  %s280_s1 = inlined_call_operand.vmem [shape: bf16[128,32], index: 1, kind: input, shape index: {}]   ;;  %s281_s2 = inlined_call_operand.vmem [shape: f32[1,32], index: 2, kind: input, shape index: {}]   ;;  %s282_s3 = inlined_call_operand.vmem [shape: f32[1,32], index: 3, kind: input, shape index: {}]   ;;  %s283_s0 = inlined_call_operand.vmem [shape: bf16[20,128], index: 0, kind: input, shape index: {}]   ;;  %s284_s4 = inlined_call_operand.vmem [shape: f32[20,32], index: 4, kind: input, shape index: {}, may-alias: {4,5}]   ;;  %s285_s5 = inlined_call_operand.vmem [shape: f32[20,32], index: 5, kind: output, shape index: {}, may-alias: {4,5}]  }
   0x1   :  { %v185_v0 = vld [vmem:[%s280_s1 + $0x38] sm:$0xff]  ;;  %v184_v1 = vld [vmem:[%s280_s1 + $0x30] sm:$0xff]  ;;  %v183_v2 = vld [vmem:[%s280_s1 + $0x28] sm:$0xff] }
   0x2   :  { %101 = vmatpush.bf16.msra.mxu0 %v185_v0  ;;  %186 = vmatpush.bf16.msra.mxu1 %v185_v0  ;;  %v182_v3 = vld [vmem:[%s280_s1 + $0x20] sm:$0xff]  ;;  %v181_v4 = vld [vmem:[%s280_s1 + $0x18] sm:$0xff]  ;;  %v180_v5 = vld [vmem:[%s280_s1 + $0x10] sm:$0xff] }
   0x3   :  { %v179_v6 = vld [vmem:[%s280_s1 + $0x8] sm:$0xff]  ;;  %v178_v9 = vld [vmem:[%s280_s1] sm:$0xff]  ;;  %v121_v19 = vld [vmem:[%s284_s4 + $0x10] sm:$0xf] }
   0x4   :  { %v22_v7 = vld [vmem:[%s283_s0 + $0x8] sm:$0x3]  ;;  %v177_v10 = vld [vmem:[%s283_s0] sm:$0xff] }
   0x5   :  { %v48_v8 = vunpack.c.l.b16 %v22_v7  ;;  %v194_v12 = vld [vmem:[%s281_s2] ss:$0 sm:$0xff] }
   0x6   :  { %102 = vmatpush.bf16.msra.mxu0 %v184_v1  ;;  %187 = vmatpush.bf16.msra.mxu1 %v184_v1  ;;  %v195_v13 = vld [vmem:[%s282_s3] ss:$0 sm:$0xff] }
   0x7   :  { %v50_v11 = vpack.c.b16 %v48_v8, %v48_v8  ;;  %v119_v18 = vld [vmem:[%s284_s4] sm:$0xff] }
   0xa   :  { %103 = vmatpush.bf16.msra.mxu0 %v183_v2  ;;  %188 = vmatpush.bf16.msra.mxu1 %v183_v2 }
   0xe   :  { %104 = vmatpush.bf16.msra.mxu0 %v182_v3  ;;  %189 = vmatpush.bf16.msra.mxu1 %v182_v3 }
  0x12   :  { %105 = vmatpush.bf16.msra.mxu0 %v181_v4  ;;  %190 = vmatpush.bf16.msra.mxu1 %v181_v4 }
  0x16   :  { %106 = vmatpush.bf16.msra.mxu0 %v180_v5  ;;  %191 = vmatpush.bf16.msra.mxu1 %v180_v5 }
  0x1a   :  { %107 = vmatpush.bf16.msra.mxu0 %v179_v6  ;;  %192 = vmatpush.bf16.msra.mxu1 %v179_v6 }
  0x1e   :  { %108 = vmatpush.bf16.msra.mxu0 %v178_v9  ;;  %193 = vmatpush.bf16.msra.mxu1 %v178_v9 }
  0x21   :  { %109 = vmatmul.bf16.vlgmr.msra.gmra.mxu0 %v177_v10  ;;  %114 = vmatmul.bf16.vlgmr.msra.gmra.mxu1 %v50_v11 }
  0x9e   :  { %v110_v14 = vpop.f32.mrf.mxu0  ;;  %v115_v15 = vpop.f32.mrf.mxu1 }
  0x9f   :  { %v111_v16 = vadd.f32 %v194_v12, %v110_v14  ;;  %v116_v17 = vadd.f32 %v194_v12, %v115_v15 }
  0xa1   :  { %v126_v20 = vmul.f32 %v195_v13, %v111_v16  ;;  %v128_v21 = vmul.f32 %v195_v13, %v116_v17 }
  0xa3   :  { %v129_v22 = vadd.f32 %v126_v20, %v119_v18  ;;  %v131_v23 = vadd.f32 %v128_v21, %v121_v19 }
  0xa5   :  { %133 = vst.msk [vmem:[%s285_s5] sm:$0xff] %vm132_vm0, %v129_v22 }
  0xa6   :  { %136 = vst.msk [vmem:[%s285_s5 + $0x10] sm:$0xf] %vm135_vm1, %v131_v23  ;;  %v112_v24 = vpop.f32.mrf.mxu0  ;;  %v117_v25 = vpop.f32.mrf.mxu1 }
  0xa7   :  { %v113_v26 = vadd.f32 %v194_v12, %v112_v24 }
  0xa9   :  { %v127_v28 = vmul.f32 %v195_v13, %v113_v26 }
  0xad   :  { %v120_v27 = vld [vmem:[%s284_s4 + $0x8] sm:$0xff] }
  0xae   :  { %v130_v29 = vadd.f32 %v127_v28, %v120_v27 }
  0xb0   :  { %134 = vst.msk [vmem:[%s285_s5 + $0x8] sm:$0xff] %vm132_vm0, %v130_v29 }

// kernel: vit_wrapper_forward.23
= control target key start
LH: loop header
LB: loop body
LE: loop exit
PB: predicated region body
PF: predicated region fallthrough
CT: control target
= control target key end

     0   :  { %vm16_vm0 = vcmask 254976   ;;  %s144_s0 = inlined_call_operand.vmem [shape: f32[2,32], index: 0, kind: input, shape index: {}]   ;;  %s145_s1 = inlined_call_operand.vmem [shape: f32[1,32], index: 1, kind: input, shape index: {}]   ;;  %s146_s2 = inlined_call_operand.vmem [shape: f32[1,32], index: 2, kind: input, shape index: {}]   ;;  %s147_s3 = inlined_call_operand.hbm [shape: f32[2,32], index: 3, kind: output, shape index: {}]  }
   0x1   :  { %v15_v0 = vld [vmem:[%s144_s0] sm:$0x3] }
   0x2   :  { %8 = vsyncpa [#allocation3], 0  ;;  %v17_v1 = vsel %vm16_vm0, %v15_v0, 0.0  ;;  %v107_v2 = vmov 32.0   ;;  %v75_v23 = vld [vmem:[%s145_s1] ss:$0 sm:$0xff] }
   0x3   :  { %18 = vadd.xlane.f32.xlu0 %v17_v1  ;;  %77 = vrcp.f32 %v107_v2  ;;  %v76_v26 = vld [vmem:[%s146_s2] ss:$0 sm:$0xff]  ;;  %s108_s17 = smov [#allocation2]   ;;  %s64_s21 = sshll.u32 %s147_s3, 4  ;;  %s65_s21 = int_to_ptr.hbm [resolvable:$true] %s64_s21 }
   0x4   :  { %s62_s18 = sshll.u32 %s108_s17, 4  ;;  %s63_s18 = int_to_ptr.vmem [resolvable:$true] %s62_s18 }
   0x9   :  { %v78_v3 = vpop.eup %77 }
   0xa   :  { %v21_v4 = vmul.f32 32.0, %v78_v3  ;;  %vm25_vm1 = vweird.f32 %v78_v3 }
   0xc   :  { %v22_v5 = vsub.f32 1.0, %v21_v4 }
   0xe   :  { %v23_v6 = vmul.f32 %v78_v3, %v22_v5 }
  0x10   :  { %v24_v7 = vadd.f32 %v78_v3, %v23_v6 }
  0x12   :  { %v26_v8 = vsel %vm25_vm1, %v78_v3, %v24_v7 }
  0x76   :  { %v19_v9 = vpop.xlane.xlu0 %18 }
  0x77   :  { %v27_v10 = vmul.f32 %v26_v8, %v19_v9 }
  0x79   :  { %v28_v11 = vsub.f32 %v15_v0, %v27_v10 }
  0x7b   :  { %v29_v12 = vmul.f32 %v28_v11, %v28_v11 }
  0x7d   :  { %v30_v13 = vsel %vm16_vm0, %v29_v12, 0.0 }
  0x7e   :  { %31 = vadd.xlane.f32.xlu0 %v30_v13 }
  0xf1   :  { %v32_v14 = vpop.xlane.xlu0 %31 }
  0xf2   :  { %v33_v15 = vmul.f32 %v32_v14, %v26_v8 }
  0xf4   :  { %v34_v16 = vadd.f32 1e-06, %v33_v15 }
  0xf6   :  { %79 = vrsqrt.f32 %v34_v16  ;;  %vm41_vm3 = vweird.f32 %v34_v16 }
  0xfc   :  { %v80_v17 = vpop.eup %79 }
  0xfd   :  { %v36_v18 = vmul.f32 %v80_v17, %v34_v16  ;;  %vm42_vm2 = vweird.f32 %v80_v17 }
  0xfe   :  { %vm43_vm4 = vmor %vm41_vm3, %vm42_vm2 }
  0xff   :  { %v37_v19 = vmul.f32 %v80_v17, %v36_v18 }
 0x101   :  { %v38_v20 = vmul.f32 0.5, %v37_v19 }
 0x103   :  { %v39_v21 = vsub.f32 1.5, %v38_v20 }
 0x105   :  { %v40_v22 = vmul.f32 %v80_v17, %v39_v21 }
 0x107   :  { %v44_v24 = vsel %vm43_vm4, %v80_v17, %v40_v22 }
 0x108   :  { %v45_v25 = vmul.f32 %v44_v24, %v28_v11 }
 0x10a   :  { %v50_v27 = vmul.f32 %v75_v23, %v45_v25 }
 0x10c   :  { %v55_v28 = vadd.f32 %v76_v26, %v50_v27 }
 0x10e   :  { %56 = vst.msk [vmem:[#allocation2] sm:$0x3] %vm16_vm0, %v55_v28 }
 0x10f   :  { %67 = dma.vmem_to_hbm [thread:$0]  %s63_s18, 32, %s65_s21, [#allocation3]  }
 0x110   :  { %105 = dma.done.wait [#allocation3], 32  }
 0x111   :  { %106 = vsyncadd [#allocation3], 4294967264 }
 0x112   :  { %72 = vsyncpa [#allocation3], 1 }

</bundles_post_ra>
